<compile_context>
chip_gen: v7x
topology: tpu7x:2x2x1
jax: 0.10.0
libtpu: 0.0.40
codegen_flags: <defaults>
</compile_context>

<pallas_src>
import functools

import jax
import jax.numpy as jnp
from jax.experimental import pallas as pl
from jax.experimental.pallas import tpu as pltpu


def _round_up(x, m):
    return ((x + m - 1) // m) * m


# ---------------------------------------------------------------------------
# Pallas kernel: the entire Gen2 MLP for one batch tile, weights VMEM-resident.
# ---------------------------------------------------------------------------
def gen2_kernel(x_ref,
                w1_ref, b1_ref,
                w2_ref, b2_ref,
                w3_ref, b3_ref,
                w4_ref, b4_ref,
                w5_ref, b5_ref,
                out_ref):
    def fc_relu(h_bf16, w_ref, b_ref):
        # bf16 x bf16 MXU matmul with f32 accumulation, f32 bias + ReLU on the
        # VPU, then immediately re-pack to bf16 so the wide intermediates
        # (TB x 512 / TB x 1024) stay half-width between layers.
        z = jnp.dot(h_bf16, w_ref[...], preferred_element_type=jnp.float32)
        return jnp.maximum(z + b_ref[...], 0.0).astype(jnp.bfloat16)

    h = x_ref[...].astype(jnp.bfloat16)
    h = fc_relu(h, w1_ref, b1_ref)     # feat_dim -> 64
    h = fc_relu(h, w2_ref, b2_ref)     # 64 -> 128
    h = fc_relu(h, w3_ref, b3_ref)     # 128 -> 512
    h = fc_relu(h, w4_ref, b4_ref)     # 512 -> 1024
    # Final plain Linear (no BN / ReLU), output padded to a lane-dense width.
    out = jnp.dot(h, w5_ref[...], preferred_element_type=jnp.float32) + b5_ref[...]
    out_ref[...] = out.astype(out_ref.dtype)


# ---------------------------------------------------------------------------
# Parameter construction (deterministic, synthetic) with BN folding + padding.
# ---------------------------------------------------------------------------
def _linear_params(key, fan_in, fan_out):
    kw, kb = jax.random.split(key)
    bound = 1.0 / jnp.sqrt(fan_in)
    w = jax.random.uniform(kw, (fan_in, fan_out), jnp.float32, -bound, bound)
    b = jax.random.uniform(kb, (fan_out,), jnp.float32, -bound, bound)
    return w, b


def _bn_params(key, features):
    kg, kb, km, kv = jax.random.split(key, 4)
    gamma = 1.0 + 0.1 * jax.random.normal(kg, (features,), jnp.float32)
    beta = 0.1 * jax.random.normal(kb, (features,), jnp.float32)
    running_mean = 0.1 * jax.random.normal(km, (features,), jnp.float32)
    running_var = 1.0 + 0.1 * jax.random.uniform(kv, (features,), jnp.float32)
    return gamma, beta, running_mean, running_var


def make_gen2_params(key, feat_dim, num_points):
    """Folds eval-mode BN into the weights/bias, pads the final layer to a
    lane-dense width, and stores weights in bf16 (biases stay f32)."""
    dims = [feat_dim, 64, 128, 512, 1024]
    eps = 1e-5
    params = {}
    keys = jax.random.split(key, 9)
    for i in range(4):
        w, b = _linear_params(keys[2 * i], dims[i], dims[i + 1])
        gamma, beta, mean, var = _bn_params(keys[2 * i + 1], dims[i + 1])
        scale = gamma / jnp.sqrt(var + eps)
        # BN(xW + b) = (xW) * scale + (b - mean) * scale + beta
        w_folded = w * scale[None, :]
        bias = (b - mean) * scale + beta
        params[f"w{i + 1}"] = w_folded.astype(jnp.bfloat16)
        params[f"b{i + 1}"] = bias.reshape(1, -1)

    out_dim = num_points * 3
    out_pad = _round_up(out_dim, 128)
    w5, b5 = _linear_params(keys[8], 1024, out_dim)
    w5 = jnp.pad(w5, ((0, 0), (0, out_pad - out_dim)))
    b5 = jnp.pad(b5, (0, out_pad - out_dim))
    params["w5"] = w5.astype(jnp.bfloat16)
    params["b5"] = b5.reshape(1, -1)
    return params


# ---------------------------------------------------------------------------
# Batch-tile selection: large tiles, >= 2 grid steps when possible, low waste.
# ---------------------------------------------------------------------------
def _choose_batch_tiling(B):
    """Returns (TB, B_pad) such that
       * TB <= 512 rows (amortizes the ~0.35 us/step pipeline overhead while
         keeping intermediates comfortably inside v5e's scoped VMEM),
       * the grid has >= 2 steps whenever B >= 16, so the 'parallel' batch
         axis shards across both TensorCores on v7x,
       * padding waste past the multiple-of-8 round-up is at most 7 rows
         (TB is derived from ceil(B/steps) instead of a fixed 256)."""
    B8 = _round_up(max(B, 1), 8)
    if B8 <= 8:
        return B8, B8
    max_tb = 512
    steps = max(2, pl.cdiv(B8, max_tb))
    tb = _round_up(pl.cdiv(B8, steps), 8)
    return tb, steps * tb


# ---------------------------------------------------------------------------
# Wrapper: 1-D batch-tile grid; weights resident, x/out streamed.
# ---------------------------------------------------------------------------
@functools.partial(jax.jit, static_argnames=("num_points",))
def gen2_forward(x, params, *, num_points):
    B, feat_dim = x.shape
    out_dim = num_points * 3
    out_pad = params["w5"].shape[1]

    TB, B_pad = _choose_batch_tiling(B)
    if B_pad != B:
        x = jnp.pad(x, ((0, B_pad - B), (0, 0)))

    operands = (
        x,
        params["w1"], params["b1"],
        params["w2"], params["b2"],
        params["w3"], params["b3"],
        params["w4"], params["b4"],
        params["w5"], params["b5"],
    )

    dims = [feat_dim, 64, 128, 512, 1024, out_pad]
    flops = 2 * B_pad * sum(dims[i] * dims[i + 1] for i in range(5))
    weight_bytes = sum(int(params[f"w{i}"].size) * 2 for i in range(1, 6))
    bias_bytes = sum(int(params[f"b{i}"].size) * 4 for i in range(1, 6))
    io_bytes = B_pad * feat_dim * 4 + B_pad * out_pad * 4
    cost = pl.CostEstimate(flops=flops, transcendentals=0,
                           bytes_accessed=weight_bytes + bias_bytes + io_bytes)

    # Weights / biases: same block every grid step -> stay VMEM-resident.
    resident = lambda shape: pl.BlockSpec(shape, lambda i: (0, 0))
    grid_spec = pltpu.PrefetchScalarGridSpec(
        num_scalar_prefetch=0,
        grid=(B_pad // TB,),
        in_specs=[
            pl.BlockSpec((TB, feat_dim), lambda i: (i, 0)),   # x tile streams
            resident((feat_dim, 64)), resident((1, 64)),
            resident((64, 128)), resident((1, 128)),
            resident((128, 512)), resident((1, 512)),
            resident((512, 1024)), resident((1, 1024)),
            resident((1024, out_pad)), resident((1, out_pad)),
        ],
        out_specs=pl.BlockSpec((TB, out_pad), lambda i: (i, 0)),
    )

    out_flat = pl.pallas_call(
        gen2_kernel,
        out_shape=jax.ShapeDtypeStruct((B_pad, out_pad), jnp.float32),
        grid_spec=grid_spec,
        compiler_params=pltpu.CompilerParams(
            dimension_semantics=("parallel",),
            # 32 MiB scoped VMEM: below v7x's 64 MiB physical, above v5e's
            # 16 MiB default, ample for 512-row tiles + resident weights.
            vmem_limit_bytes=32 * 1024 * 1024,
        ),
        cost_estimate=cost,
    )(*operands)

    return out_flat[:B, :out_dim].reshape(B, num_points, 3)


# ---------------------------------------------------------------------------
# Pure-JAX reference (same bf16 weights, f32 accumulation) for a sanity check.
# ---------------------------------------------------------------------------
def gen2_reference(x, params, num_points):
    h = x.astype(jnp.float32)
    for i in range(1, 5):
        z = jnp.dot(h.astype(jnp.bfloat16), params[f"w{i}"],
                    preferred_element_type=jnp.float32)
        h = jnp.maximum(z + params[f"b{i}"], 0.0)
    out = jnp.dot(h.astype(jnp.bfloat16), params["w5"],
                  preferred_element_type=jnp.float32) + params["b5"]
    return out[:, : num_points * 3].reshape(x.shape[0], num_points, 3)


if __name__ == "__main__":
    # Small, module-consistent shapes: args.feat_dim=32, args.num_points=64, batch=8.
    B, FEAT_DIM, NUM_POINTS = 8, 32, 64

    key = jax.random.PRNGKey(0)
    k_x, k_p = jax.random.split(key)
    x = jax.random.normal(k_x, (B, FEAT_DIM), jnp.float32)
    params = make_gen2_params(k_p, FEAT_DIM, NUM_POINTS)

    out = gen2_forward(x, params, num_points=NUM_POINTS)
    out = jax.block_until_ready(out)

    ref = gen2_reference(x, params, NUM_POINTS)
    assert out.shape == (B, NUM_POINTS, 3), out.shape
    # bf16 weights/activations on both sides; residual diff is accumulation order.
    assert jnp.allclose(out, ref, atol=1e-2, rtol=1e-2), "mismatch vs reference"

    # Also exercise a batch large enough to produce a multi-step grid
    # (>= 2 TensorCore shards on v7x) with the low-waste tiling path.
    B2 = 260
    x2 = jax.random.normal(jax.random.PRNGKey(1), (B2, FEAT_DIM), jnp.float32)
    out2 = jax.block_until_ready(gen2_forward(x2, params, num_points=NUM_POINTS))
    ref2 = gen2_reference(x2, params, NUM_POINTS)
    assert out2.shape == (B2, NUM_POINTS, 3), out2.shape
    assert jnp.allclose(out2, ref2, atol=1e-2, rtol=1e-2), "mismatch vs reference (B=260)"

    print("KERNEL_OK")
</pallas_src>

<mosaic_0001>
module attributes {stable_mosaic.version = 11 : i64} {
  func.func @gen2_kernel(%arg0: i32, %arg1: memref<8x32xf32, #tpu.memory_space<vmem>>, %arg2: memref<32x64xbf16, #tpu.memory_space<vmem>>, %arg3: memref<1x64xf32, #tpu.memory_space<vmem>>, %arg4: memref<64x128xbf16, #tpu.memory_space<vmem>>, %arg5: memref<1x128xf32, #tpu.memory_space<vmem>>, %arg6: memref<128x512xbf16, #tpu.memory_space<vmem>>, %arg7: memref<1x512xf32, #tpu.memory_space<vmem>>, %arg8: memref<512x1024xbf16, #tpu.memory_space<vmem>>, %arg9: memref<1x1024xf32, #tpu.memory_space<vmem>>, %arg10: memref<1024x256xbf16, #tpu.memory_space<vmem>>, %arg11: memref<1x256xf32, #tpu.memory_space<vmem>>, %arg12: memref<8x256xf32, #tpu.memory_space<vmem>>) attributes {dimension_semantics = [#tpu.dimension_semantics<parallel>], iteration_bounds = array<i64: 1>, scalar_prefetch = 0 : i64, scratch_operands = 0 : i64, tpu.core_type = #tpu.core_type<tc>, window_params = [{transform_indices = @transform_0, window_bounds = array<i64: 8, 32>}, {pipeline_mode = #tpu.pipeline_mode<synchronous>, transform_indices = @transform_1, window_bounds = array<i64: 32, 64>}, {pipeline_mode = #tpu.pipeline_mode<synchronous>, transform_indices = @transform_2, window_bounds = array<i64: 1, 64>}, {pipeline_mode = #tpu.pipeline_mode<synchronous>, transform_indices = @transform_3, window_bounds = array<i64: 64, 128>}, {pipeline_mode = #tpu.pipeline_mode<synchronous>, transform_indices = @transform_4, window_bounds = array<i64: 1, 128>}, {pipeline_mode = #tpu.pipeline_mode<synchronous>, transform_indices = @transform_5, window_bounds = array<i64: 128, 512>}, {pipeline_mode = #tpu.pipeline_mode<synchronous>, transform_indices = @transform_6, window_bounds = array<i64: 1, 512>}, {pipeline_mode = #tpu.pipeline_mode<synchronous>, transform_indices = @transform_7, window_bounds = array<i64: 512, 1024>}, {pipeline_mode = #tpu.pipeline_mode<synchronous>, transform_indices = @transform_8, window_bounds = array<i64: 1, 1024>}, {pipeline_mode = #tpu.pipeline_mode<synchronous>, transform_indices = @transform_9, window_bounds = array<i64: 1024, 256>}, {pipeline_mode = #tpu.pipeline_mode<synchronous>, transform_indices = @transform_10, window_bounds = array<i64: 1, 256>}, {transform_indices = @transform_11, window_bounds = array<i64: 8, 256>}]} {
    %c0 = arith.constant 0 : index
    %c0_0 = arith.constant 0 : index
    %0 = vector.load %arg1[%c0, %c0_0] : memref<8x32xf32, #tpu.memory_space<vmem>>, vector<8x32xf32>
    %1 = arith.truncf %0 : vector<8x32xf32> to vector<8x32xbf16>
    %c0_1 = arith.constant 0 : index
    %c0_2 = arith.constant 0 : index
    %2 = vector.load %arg2[%c0_1, %c0_2] : memref<32x64xbf16, #tpu.memory_space<vmem>>, vector<32x64xbf16>
    %cst = arith.constant dense<0.000000e+00> : vector<8x64xf32>
    %3 = tpu.matmul %1, %2, %cst {dimension_numbers = #tpu.dot_dimension_numbers<[1], [0], [0], [1], [0, 0, 1, 1], [], []>} : vector<8x32xbf16>, vector<32x64xbf16>, vector<8x64xf32> -> vector<8x64xf32>
    %c0_3 = arith.constant 0 : index
    %c0_4 = arith.constant 0 : index
    %4 = vector.load %arg3[%c0_3, %c0_4] : memref<1x64xf32, #tpu.memory_space<vmem>>, vector<1x64xf32>
    %5 = vector.broadcast %4 : vector<1x64xf32> to vector<8x64xf32>
    %6 = arith.addf %3, %5 : vector<8x64xf32>
    %cst_5 = arith.constant 0.000000e+00 : f32
    %7 = vector.broadcast %cst_5 : f32 to vector<8x64xf32>
    %8 = arith.maximumf %6, %7 : vector<8x64xf32>
    %9 = arith.truncf %8 : vector<8x64xf32> to vector<8x64xbf16>
    %c0_6 = arith.constant 0 : index
    %c0_7 = arith.constant 0 : index
    %10 = vector.load %arg4[%c0_6, %c0_7] : memref<64x128xbf16, #tpu.memory_space<vmem>>, vector<64x128xbf16>
    %cst_8 = arith.constant dense<0.000000e+00> : vector<8x128xf32>
    %11 = tpu.matmul %9, %10, %cst_8 {dimension_numbers = #tpu.dot_dimension_numbers<[1], [0], [0], [1], [0, 0, 1, 1], [], []>} : vector<8x64xbf16>, vector<64x128xbf16>, vector<8x128xf32> -> vector<8x128xf32>
    %c0_9 = arith.constant 0 : index
    %c0_10 = arith.constant 0 : index
    %12 = vector.load %arg5[%c0_9, %c0_10] : memref<1x128xf32, #tpu.memory_space<vmem>>, vector<1x128xf32>
    %13 = vector.broadcast %12 : vector<1x128xf32> to vector<8x128xf32>
    %14 = arith.addf %11, %13 : vector<8x128xf32>
    %cst_11 = arith.constant 0.000000e+00 : f32
    %15 = vector.broadcast %cst_11 : f32 to vector<8x128xf32>
    %16 = arith.maximumf %14, %15 : vector<8x128xf32>
    %17 = arith.truncf %16 : vector<8x128xf32> to vector<8x128xbf16>
    %c0_12 = arith.constant 0 : index
    %c0_13 = arith.constant 0 : index
    %18 = vector.load %arg6[%c0_12, %c0_13] : memref<128x512xbf16, #tpu.memory_space<vmem>>, vector<128x512xbf16>
    %cst_14 = arith.constant dense<0.000000e+00> : vector<8x512xf32>
    %19 = tpu.matmul %17, %18, %cst_14 {dimension_numbers = #tpu.dot_dimension_numbers<[1], [0], [0], [1], [0, 0, 1, 1], [], []>} : vector<8x128xbf16>, vector<128x512xbf16>, vector<8x512xf32> -> vector<8x512xf32>
    %c0_15 = arith.constant 0 : index
    %c0_16 = arith.constant 0 : index
    %20 = vector.load %arg7[%c0_15, %c0_16] : memref<1x512xf32, #tpu.memory_space<vmem>>, vector<1x512xf32>
    %21 = vector.broadcast %20 : vector<1x512xf32> to vector<8x512xf32>
    %22 = arith.addf %19, %21 : vector<8x512xf32>
    %cst_17 = arith.constant 0.000000e+00 : f32
    %23 = vector.broadcast %cst_17 : f32 to vector<8x512xf32>
    %24 = arith.maximumf %22, %23 : vector<8x512xf32>
    %25 = arith.truncf %24 : vector<8x512xf32> to vector<8x512xbf16>
    %c0_18 = arith.constant 0 : index
    %c0_19 = arith.constant 0 : index
    %26 = vector.load %arg8[%c0_18, %c0_19] : memref<512x1024xbf16, #tpu.memory_space<vmem>>, vector<512x1024xbf16>
    %cst_20 = arith.constant dense<0.000000e+00> : vector<8x1024xf32>
    %27 = tpu.matmul %25, %26, %cst_20 {dimension_numbers = #tpu.dot_dimension_numbers<[1], [0], [0], [1], [0, 0, 1, 1], [], []>} : vector<8x512xbf16>, vector<512x1024xbf16>, vector<8x1024xf32> -> vector<8x1024xf32>
    %c0_21 = arith.constant 0 : index
    %c0_22 = arith.constant 0 : index
    %28 = vector.load %arg9[%c0_21, %c0_22] : memref<1x1024xf32, #tpu.memory_space<vmem>>, vector<1x1024xf32>
    %29 = vector.broadcast %28 : vector<1x1024xf32> to vector<8x1024xf32>
    %30 = arith.addf %27, %29 : vector<8x1024xf32>
    %cst_23 = arith.constant 0.000000e+00 : f32
    %31 = vector.broadcast %cst_23 : f32 to vector<8x1024xf32>
    %32 = arith.maximumf %30, %31 : vector<8x1024xf32>
    %33 = arith.truncf %32 : vector<8x1024xf32> to vector<8x1024xbf16>
    %c0_24 = arith.constant 0 : index
    %c0_25 = arith.constant 0 : index
    %34 = vector.load %arg10[%c0_24, %c0_25] : memref<1024x256xbf16, #tpu.memory_space<vmem>>, vector<1024x256xbf16>
    %cst_26 = arith.constant dense<0.000000e+00> : vector<8x256xf32>
    %35 = tpu.matmul %33, %34, %cst_26 {dimension_numbers = #tpu.dot_dimension_numbers<[1], [0], [0], [1], [0, 0, 1, 1], [], []>} : vector<8x1024xbf16>, vector<1024x256xbf16>, vector<8x256xf32> -> vector<8x256xf32>
    %c0_27 = arith.constant 0 : index
    %c0_28 = arith.constant 0 : index
    %36 = vector.load %arg11[%c0_27, %c0_28] : memref<1x256xf32, #tpu.memory_space<vmem>>, vector<1x256xf32>
    %37 = vector.broadcast %36 : vector<1x256xf32> to vector<8x256xf32>
    %38 = arith.addf %35, %37 : vector<8x256xf32>
    %c0_29 = arith.constant 0 : index
    %c0_30 = arith.constant 0 : index
    %39 = vector.load %arg12[%c0_29, %c0_30] : memref<8x256xf32, #tpu.memory_space<vmem>>, vector<8x256xf32>
    tpu.vector_store %arg12[%c0_29, %c0_30], %38 {strides = array<i32>} : memref<8x256xf32, #tpu.memory_space<vmem>>, vector<8x256xf32>,
    return
  }
  func.func @transform_0(%arg0: i32) -> (i32, i32) {
    %c0_i32 = arith.constant 0 : i32
    %c0_i32_0 = arith.constant 0 : i32
    return %arg0, %c0_i32 : i32, i32
  }
  func.func @transform_1(%arg0: i32) -> (i32, i32) {
    %c0_i32 = arith.constant 0 : i32
    %c0_i32_0 = arith.constant 0 : i32
    %c0_i32_1 = arith.constant 0 : i32
    return %c0_i32, %c0_i32_0 : i32, i32
  }
  func.func @transform_2(%arg0: i32) -> (i32, i32) {
    %c0_i32 = arith.constant 0 : i32
    %c0_i32_0 = arith.constant 0 : i32
    %c0_i32_1 = arith.constant 0 : i32
    return %c0_i32, %c0_i32_0 : i32, i32
  }
  func.func @transform_3(%arg0: i32) -> (i32, i32) {
    %c0_i32 = arith.constant 0 : i32
    %c0_i32_0 = arith.constant 0 : i32
    %c0_i32_1 = arith.constant 0 : i32
    return %c0_i32, %c0_i32_0 : i32, i32
  }
  func.func @transform_4(%arg0: i32) -> (i32, i32) {
    %c0_i32 = arith.constant 0 : i32
    %c0_i32_0 = arith.constant 0 : i32
    %c0_i32_1 = arith.constant 0 : i32
    return %c0_i32, %c0_i32_0 : i32, i32
  }
  func.func @transform_5(%arg0: i32) -> (i32, i32) {
    %c0_i32 = arith.constant 0 : i32
    %c0_i32_0 = arith.constant 0 : i32
    %c0_i32_1 = arith.constant 0 : i32
    return %c0_i32, %c0_i32_0 : i32, i32
  }
  func.func @transform_6(%arg0: i32) -> (i32, i32) {
    %c0_i32 = arith.constant 0 : i32
    %c0_i32_0 = arith.constant 0 : i32
    %c0_i32_1 = arith.constant 0 : i32
    return %c0_i32, %c0_i32_0 : i32, i32
  }
  func.func @transform_7(%arg0: i32) -> (i32, i32) {
    %c0_i32 = arith.constant 0 : i32
    %c0_i32_0 = arith.constant 0 : i32
    %c0_i32_1 = arith.constant 0 : i32
    return %c0_i32, %c0_i32_0 : i32, i32
  }
  func.func @transform_8(%arg0: i32) -> (i32, i32) {
    %c0_i32 = arith.constant 0 : i32
    %c0_i32_0 = arith.constant 0 : i32
    %c0_i32_1 = arith.constant 0 : i32
    return %c0_i32, %c0_i32_0 : i32, i32
  }
  func.func @transform_9(%arg0: i32) -> (i32, i32) {
    %c0_i32 = arith.constant 0 : i32
    %c0_i32_0 = arith.constant 0 : i32
    %c0_i32_1 = arith.constant 0 : i32
    return %c0_i32, %c0_i32_0 : i32, i32
  }
  func.func @transform_10(%arg0: i32) -> (i32, i32) {
    %c0_i32 = arith.constant 0 : i32
    %c0_i32_0 = arith.constant 0 : i32
    %c0_i32_1 = arith.constant 0 : i32
    return %c0_i32, %c0_i32_0 : i32, i32
  }
  func.func @transform_11(%arg0: i32) -> (i32, i32) {
    %c0_i32 = arith.constant 0 : i32
    %c0_i32_0 = arith.constant 0 : i32
    return %arg0, %c0_i32 : i32, i32
  }
}

</mosaic_0001>

<bundles_post_ra>
// kernel: gen2_forward.1
= control target key start
LH: loop header
LB: loop body
LE: loop exit
PB: predicated region body
PF: predicated region fallthrough
CT: control target
= control target key end

     0   :  { %16 = vsyncpa [#allocation3], 0  ;;  %s4697_s0 = inlined_call_operand.hbm [shape: f32[8,32], index: 0, kind: input, shape index: {}]   ;;  %s4698_s1 = inlined_call_operand.vmem [shape: bf16[32,64], index: 1, kind: input, shape index: {}]   ;;  %s4699_s2 = inlined_call_operand.hbm [shape: f32[1,64], index: 2, kind: input, shape index: {}]   ;;  %s4700_s3 = inlined_call_operand.hbm [shape: bf16[64,128], index: 3, kind: input, shape index: {}]   ;;  %s4701_s4 = inlined_call_operand.hbm [shape: f32[1,128], index: 4, kind: input, shape index: {}]   ;;  %s4702_s5 = inlined_call_operand.hbm [shape: bf16[128,512], index: 5, kind: input, shape index: {}]   ;;  %s4703_s6 = inlined_call_operand.vmem [shape: f32[1,512], index: 6, kind: input, shape index: {}]   ;;  %s4704_s7 = inlined_call_operand.hbm [shape: bf16[512,1024], index: 7, kind: input, shape index: {}]   ;;  %s4705_s8 = inlined_call_operand.hbm [shape: f32[1,1024], index: 8, kind: input, shape index: {}]   ;;  %s4706_s9 = inlined_call_operand.hbm [shape: bf16[1024,256], index: 9, kind: input, shape index: {}]   ;;  %s4707_s10 = inlined_call_operand.vmem [shape: f32[1,256], index: 10, kind: input, shape index: {}]   ;;  %s4708_s11 = inlined_call_operand.vmem [shape: f32[8,256], index: 11, kind: output, shape index: {}]  }
   0x1   :  { %17 = vsyncpa [#allocation5], 0 }
   0x2   :  { %18 = vsyncpa [#allocation8], 0 }
   0x3   :  { %19 = vsyncpa [#allocation11], 0 }
   0x4   :  { %20 = vsyncpa [#allocation14], 0  ;;  %s4420_s17 = smov [#allocation4]   ;;  %s4421_s19 = smov [#allocation7]  }
   0x5   :  { %s39_s18 = sshll.u32 %s4420_s17, 4  ;;  %s61_s20 = sshll.u32 %s4421_s19, 4  ;;  %s40_s18 = int_to_ptr.vmem [resolvable:$true] %s39_s18  ;;  %s62_s20 = int_to_ptr.vmem [resolvable:$true] %s61_s20 }
   0x6   :  { %s4234_s23 = scalar_lea.hbm %s4699_s2, 16 }
   0x7   :  { %p4235_p0 = scmp.ne.s32.totalorder %s4699_s2, %s4234_s23  ;;  %p4238_p1 = scmp.lt.u32.totalorder %s4234_s23, %s4699_s2 }
   0x9   :  { %p4240_p2 = pnand %p4238_p1, %p4235_p0 }
   0xb   :  { %4243 = shalt.err (!%p4240_p2)
}
   0xc   :  { %s4244_s28 = scalar_lea.vmem %s40_s18, 16  ;;  %s4248_s29 = scalar_lea.vmem %s40_s18, 32 }
   0xd   :  { %p4245_p3 = scmp.ne.s32.totalorder %s40_s18, %s4244_s28  ;;  %p4249_p4 = scmp.lt.s32.totalorder %s40_s18, %s40_s18 }
   0xe   :  { %p4250_p5 = scmp.lt.s32.totalorder %s4248_s29, %s4244_s28 }
  0x10   :  { %p4251_p6 = por %p4250_p5, %p4249_p4 }
  0x12   :  { %p4252_p7 = pnand %p4251_p6, %p4245_p3 }
  0x14   :  { %4255 = shalt.err (!%p4252_p7)
}
  0x15   :  { %42 = dma.hbm_to_vmem [thread:$0]  %s4699_s2, 16, %s40_s18, [#allocation5]  }
  0x16   :  { %s4256_s15 = scalar_lea.hbm %s4701_s4, 16 }
  0x17   :  { %p4257_p8 = scmp.ne.s32.totalorder %s4701_s4, %s4256_s15  ;;  %p4260_p9 = scmp.lt.u32.totalorder %s4256_s15, %s4701_s4 }
  0x19   :  { %p4262_p10 = pnand %p4260_p9, %p4257_p8 }
  0x1b   :  { %4265 = shalt.err (!%p4262_p10)
}
  0x1c   :  { %s4266_s22 = scalar_lea.vmem %s62_s20, 16  ;;  %s4270_s23 = scalar_lea.vmem %s62_s20, 32 }
  0x1d   :  { %p4267_p11 = scmp.ne.s32.totalorder %s62_s20, %s4266_s22  ;;  %p4271_p12 = scmp.lt.s32.totalorder %s62_s20, %s62_s20 }
  0x1e   :  { %p4272_p13 = scmp.lt.s32.totalorder %s4270_s23, %s4266_s22 }
  0x20   :  { %p4273_p0 = por %p4272_p13, %p4271_p12 }
  0x22   :  { %p4274_p1 = pnand %p4273_p0, %p4267_p11 }
  0x24   :  { %4277 = shalt.err (!%p4274_p1)
}
  0x25   :  { %64 = dma.hbm_to_vmem [thread:$0]  %s4701_s4, 16, %s62_s20, [#allocation8]  }
  0x26   :  { %s4422_s24 = smov [#allocation10]   ;;  %s4278_s28 = scalar_lea.hbm %s4704_s7, 32768 }
  0x27   :  { %s84_s25 = sshll.u32 %s4422_s24, 4  ;;  %p4279_p2 = scmp.ne.s32.totalorder %s4704_s7, %s4278_s28  ;;  %s85_s25 = int_to_ptr.vmem [resolvable:$true] %s84_s25 }
  0x28   :  { %p4282_p3 = scmp.lt.u32.totalorder %s4278_s28, %s4704_s7 }
  0x2a   :  { %p4284_p4 = pnand %p4282_p3, %p4279_p2 }
  0x2c   :  { %4287 = shalt.err (!%p4284_p4)
}
  0x2d   :  { %s4288_s14 = scalar_lea.vmem %s85_s25, 32768  ;;  %p4293_p6 = scmp.lt.s32.totalorder %s85_s25, %s85_s25 }
  0x2e   :  { %p4289_p5 = scmp.ne.s32.totalorder %s85_s25, %s4288_s14  ;;  %p4294_p7 = scmp.lt.s32.totalorder %s4288_s14, %s4288_s14 }
  0x30   :  { %p4295_p8 = por %p4294_p7, %p4293_p6 }
  0x32   :  { %p4296_p9 = pnand %p4295_p8, %p4289_p5 }
  0x34   :  { %4299 = shalt.err (!%p4296_p9)
}
  0x35   :  { %s4423_s4 = smov 512   ;;  %s4424_s20 = smov 32  }
  0x36   :  { %90 = dma.hbm_to_vmem [thread:$0]  %s4704_s7, 32768, %s85_s25, [#allocation11], %s4423_s4, %s4423_s4, %s4424_s20  }
  0x37   :  { %s4425_s17 = smov [#allocation2]   ;;  %s4426_s21 = smov [#allocation6]  }
  0x38   :  { %s27_s19 = sshll.u32 %s4425_s17, 4  ;;  %s48_s22 = sshll.u32 %s4426_s21, 4  ;;  %s28_s19 = int_to_ptr.vmem [resolvable:$true] %s27_s19  ;;  %s49_s22 = int_to_ptr.vmem [resolvable:$true] %s48_s22 }
  0x39   :  { %s4300_s18 = scalar_lea.hbm %s4697_s0, 128 }
  0x3a   :  { %p4301_p10 = scmp.ne.s32.totalorder %s4697_s0, %s4300_s18  ;;  %p4304_p11 = scmp.lt.u32.totalorder %s4300_s18, %s4697_s0 }
  0x3c   :  { %p4306_p12 = pnand %p4304_p11, %p4301_p10 }
  0x3e   :  { %4309 = shalt.err (!%p4306_p12)
}
  0x3f   :  { %s4310_s7 = scalar_lea.vmem %s28_s19, 128  ;;  %p4315_p0 = scmp.lt.s32.totalorder %s28_s19, %s28_s19 }
  0x40   :  { %p4311_p13 = scmp.ne.s32.totalorder %s28_s19, %s4310_s7  ;;  %p4316_p1 = scmp.lt.s32.totalorder %s4310_s7, %s4310_s7 }
  0x42   :  { %p4317_p2 = por %p4316_p1, %p4315_p0 }
  0x44   :  { %p4318_p3 = pnand %p4317_p2, %p4311_p13 }
  0x46   :  { %4321 = shalt.err (!%p4318_p3)
}
  0x47   :  { %30 = dma.hbm_to_vmem [thread:$0]  %s4697_s0, 128, %s28_s19, [#allocation3]  }
  0x48   :  { %s4322_s13 = scalar_lea.hbm %s4700_s3, 512 }
  0x49   :  { %p4323_p4 = scmp.ne.s32.totalorder %s4700_s3, %s4322_s13  ;;  %p4326_p5 = scmp.lt.u32.totalorder %s4322_s13, %s4700_s3 }
  0x4b   :  { %p4328_p6 = pnand %p4326_p5, %p4323_p4 }
  0x4d   :  { %4331 = shalt.err (!%p4328_p6)
}
  0x4e   :  { %s4332_s16 = scalar_lea.vmem %s49_s22, 512  ;;  %p4337_p8 = scmp.lt.s32.totalorder %s49_s22, %s49_s22 }
  0x4f   :  { %p4333_p7 = scmp.ne.s32.totalorder %s49_s22, %s4332_s16  ;;  %p4338_p9 = scmp.lt.s32.totalorder %s4332_s16, %s4332_s16 }
  0x51   :  { %p4339_p10 = por %p4338_p9, %p4337_p8 }
  0x53   :  { %p4340_p11 = pnand %p4339_p10, %p4333_p7 }
  0x55   :  { %4343 = shalt.err (!%p4340_p11)
}
  0x56   :  { %s4427_s0 = smov 64   ;;  %s4428_s17 = smov 4  }
  0x57   :  { %54 = dma.hbm_to_vmem [thread:$0]  %s4700_s3, 512, %s49_s22, [#allocation5], %s4427_s0, %s4427_s0, %s4428_s17  }
  0x58   :  { %s4429_s23 = smov [#allocation9]   ;;  %s4344_s26 = scalar_lea.hbm %s4702_s5, 4096 }
  0x59   :  { %s70_s2 = sshll.u32 %s4429_s23, 4  ;;  %p4345_p12 = scmp.ne.s32.totalorder %s4702_s5, %s4344_s26  ;;  %s71_s2 = int_to_ptr.vmem [resolvable:$true] %s70_s2 }
  0x5a   :  { %p4348_p13 = scmp.lt.u32.totalorder %s4344_s26, %s4702_s5 }
  0x5c   :  { %p4350_p0 = pnand %p4348_p13, %p4345_p12 }
  0x5e   :  { %4353 = shalt.err (!%p4350_p0)
}
  0x5f   :  { %s4354_s29 = scalar_lea.vmem %s71_s2, 4096  ;;  %p4359_p2 = scmp.lt.s32.totalorder %s71_s2, %s71_s2 }
  0x60   :  { %p4355_p1 = scmp.ne.s32.totalorder %s71_s2, %s4354_s29  ;;  %p4360_p3 = scmp.lt.s32.totalorder %s4354_s29, %s4354_s29 }
  0x62   :  { %p4361_p4 = por %p4360_p3, %p4359_p2 }
  0x64   :  { %p4362_p5 = pnand %p4361_p4, %p4355_p1 }
  0x66   :  { %4365 = shalt.err (!%p4362_p5)
}
  0x67   :  { %s4430_s3 = smov 256   ;;  %s4431_s22 = smov 16  }
  0x68   :  { %76 = dma.hbm_to_vmem [thread:$0]  %s4702_s5, 4096, %s71_s2, [#allocation8], %s4430_s3, %s4430_s3, %s4431_s22  }
  0x69   :  { %s4432_s13 = smov [#allocation12]   ;;  %s4433_s4 = smov [#allocation13]  }
  0x6a   :  { %s97_s14 = sshll.u32 %s4432_s13, 4  ;;  %s106_s20 = sshll.u32 %s4433_s4, 4  ;;  %s98_s14 = int_to_ptr.vmem [resolvable:$true] %s97_s14  ;;  %s4571_s20 = int_to_ptr.vmem [resolvable:$true] %s106_s20 }
  0x6b   :  { %s4366_s0 = scalar_lea.hbm %s4705_s8, 128 }
  0x6c   :  { %p4367_p6 = scmp.ne.s32.totalorder %s4705_s8, %s4366_s0  ;;  %p4370_p7 = scmp.lt.u32.totalorder %s4366_s0, %s4705_s8 }
  0x6e   :  { %p4372_p8 = pnand %p4370_p7, %p4367_p6 }
  0x70   :  { %4375 = shalt.err (!%p4372_p8)
}
  0x71   :  { %s4376_s5 = scalar_lea.vmem %s98_s14, 128  ;;  %p4381_p10 = scmp.lt.s32.totalorder %s98_s14, %s98_s14 }
  0x72   :  { %p4377_p9 = scmp.ne.s32.totalorder %s98_s14, %s4376_s5  ;;  %p4382_p11 = scmp.lt.s32.totalorder %s4376_s5, %s4376_s5 }
  0x74   :  { %p4383_p12 = por %p4382_p11, %p4381_p10 }
  0x76   :  { %p4384_p13 = pnand %p4383_p12, %p4377_p9 }
  0x78   :  { %4387 = shalt.err (!%p4384_p13)
}
  0x79   :  { %100 = dma.hbm_to_vmem [thread:$0]  %s4705_s8, 128, %s98_s14, [#allocation11]  }
  0x7a   :  { %s4388_s27 = scalar_lea.hbm %s4706_s9, 16384 }
  0x7b   :  { %p4389_p0 = scmp.ne.s32.totalorder %s4706_s9, %s4388_s27  ;;  %p4392_p1 = scmp.lt.u32.totalorder %s4388_s27, %s4706_s9 }
  0x7d   :  { %p4394_p2 = pnand %p4392_p1, %p4389_p0 }
  0x7f   :  { %4397 = shalt.err (!%p4394_p2)
}
  0x80   :  { %s4398_s3 = scalar_lea.vmem %s4571_s20, 16384  ;;  %p4403_p4 = scmp.lt.s32.totalorder %s4571_s20, %s4571_s20 }
  0x81   :  { %p4399_p3 = scmp.ne.s32.totalorder %s4571_s20, %s4398_s3  ;;  %p4404_p5 = scmp.lt.s32.totalorder %s4398_s3, %s4398_s3 }
  0x83   :  { %p4405_p6 = por %p4404_p5, %p4403_p4 }
  0x85   :  { %p4406_p7 = pnand %p4405_p6, %p4399_p3 }
  0x87   :  { %4409 = shalt.err (!%p4406_p7)
}
  0x88   :  { %s4434_s8 = smov 128   ;;  %s4435_s22 = smov 8  }
  0x89   :  { %112 = dma.hbm_to_vmem [thread:$0]  %s4706_s9, 16384, %s4571_s20, [#allocation14], %s4434_s8, %s4434_s8, %s4435_s22  }
  0x8a   :  { %4410 = dma.done.wait [#allocation3], 128  }
  0x8b   :  { %4411 = vsyncadd [#allocation3], 4294967168 }
  0x8c   :  { %4412 = dma.done.wait [#allocation5], 528  }
  0x8d   :  { %4413 = vsyncadd [#allocation5], 4294966768 }
  0x8e   :  { %4414 = dma.done.wait [#allocation8], 4112  }
  0x8f   :  { %4415 = vsyncadd [#allocation8], 4294963184 }
  0x90   :  { %4416 = dma.done.wait [#allocation11], 32896  }
  0x91   :  { %4417 = vsyncadd [#allocation11], 4294934400 }
  0x92   :  { %4418 = dma.done.wait [#allocation14], 16384  }
  0x93   :  { %4419 = vsyncadd [#allocation14], 4294950912  ;;  %v4436_v0 = vmov 0.0   ;;  %vm4437_vm0 = vmmov 0   ;;  %v3988_v1 = vld [vmem:[%s4698_s1] sm:$0xff]   ;;  %v3989_v2 = vld [vmem:[%s4698_s1 + $0x8] sm:$0xff]  }
  0x94   :  { %3911 = vmatprep.subr.bf16.mxu0 %v4436_v0  ;;  %3915 = vmatprep.mubr.msk.bf16.mxu0 %vm4437_vm0, %v4436_v0  ;;  %v140_v3 = vld [vmem:[#allocation2] sm:$0xff]  ;;  %v3990_v4 = vld [vmem:[#allocation6] sm:$0xff]   ;;  %v3991_v5 = vld [vmem:[#allocation6 + $0x8] sm:$0xff]   ;;  %vm165_vm1 = vcmask 261120   ;;  %vm250_vm2 = vcmask 523264   ;;  %v4438_v49 = vmov 0  }
  0x95   :  { %3919 = vmatprep.subr.bf16.mxu1 %v4436_v0  ;;  %3927 = vmatprep.mubr.msk.bf16.mxu1 %vm4437_vm0, %v4436_v0  ;;  %v141_v6 = vpack.c.bf16 %v140_v3, %v140_v3  ;;  %v3992_v7 = vld [vmem:[#allocation6 + $0x10] sm:$0xff]   ;;  %v3993_v8 = vld [vmem:[#allocation6 + $0x18] sm:$0xff]   ;;  %v600_v50 = vld [vmem:[#allocation10] sm:$0xff] }
  0x96   :  { %3912 = vmatpush3.bf16.msra.mxu0 %v3988_v1  ;;  %3920 = vmatpush3.bf16.msra.mxu1 %v3990_v4  ;;  %v3994_v9 = vld [vmem:[#allocation9] ss:$16 sps:$4 sm:$0xff]   ;;  %v3996_v10 = vld [vmem:[#allocation9 + $0x4] ss:$16 sps:$4 sm:$0xff]   ;;  %v3999_v11 = vld [vmem:[#allocation9 + $0xc] ss:$16 sps:$4 sm:$0xff]  }
  0x97   :  { %3913 = vmatprep.subr.bf16.mxu0 %v4436_v0  ;;  %3921 = vmatprep.subr.bf16.mxu1 %v4436_v0  ;;  %v4002_v12 = vld [vmem:[#allocation9 + $0x24] ss:$16 sps:$4 sm:$0xff]   ;;  %v4000_v13 = vld [vmem:[#allocation9 + $0x20] ss:$16 sps:$4 sm:$0xff]   ;;  %v3477_v24 = vld [vmem:[#allocation4] ss:$0 sm:$0xff] }
  0x98   :  { %v4008_v14 = vld [vmem:[#allocation9 + $0x44] ss:$16 sps:$4 sm:$0xff]   ;;  %v4006_v15 = vld [vmem:[#allocation9 + $0x40] ss:$16 sps:$4 sm:$0xff]   ;;  %v3997_v31 = vld [vmem:[#allocation9 + $0x8] ss:$16 sps:$4 sm:$0xff]  }
  0x99   :  { %v4014_v16 = vld [vmem:[#allocation9 + $0x64] ss:$16 sps:$4 sm:$0xff]   ;;  %v4012_v17 = vld [vmem:[#allocation9 + $0x60] ss:$16 sps:$4 sm:$0xff]   ;;  %v4005_v33 = vld [vmem:[#allocation9 + $0x2c] ss:$16 sps:$4 sm:$0xff]  }
  0x9a   :  { %3914 = vmatpush3.bf16.msra.mxu0 %v3989_v2  ;;  %3922 = vmatpush3.bf16.msra.mxu1 %v3991_v5  ;;  %v4020_v18 = vld [vmem:[#allocation9 + $0x84] ss:$16 sps:$4 sm:$0xff]   ;;  %v4018_v19 = vld [vmem:[#allocation9 + $0x80] ss:$16 sps:$4 sm:$0xff]   ;;  %v4003_v34 = vld [vmem:[#allocation9 + $0x28] ss:$16 sps:$4 sm:$0xff]  }
  0x9b   :  { %3923 = vmatprep.subr.bf16.mxu1 %v4436_v0  ;;  %510 = vmatprep.subr.bf16.mxu0 %v3996_v10  ;;  %v4026_v20 = vld [vmem:[#allocation9 + $0xa4] ss:$16 sps:$4 sm:$0xff]   ;;  %v4024_v21 = vld [vmem:[#allocation9 + $0xa0] ss:$16 sps:$4 sm:$0xff]   ;;  %v4011_v35 = vld [vmem:[#allocation9 + $0x4c] ss:$16 sps:$4 sm:$0xff]  }
  0x9c   :  { %v4032_v22 = vld [vmem:[#allocation9 + $0xc4] ss:$16 sps:$4 sm:$0xff]   ;;  %v4030_v23 = vld [vmem:[#allocation9 + $0xc0] ss:$16 sps:$4 sm:$0xff]   ;;  %v4009_v36 = vld [vmem:[#allocation9 + $0x48] ss:$16 sps:$4 sm:$0xff]  }
  0x9d   :  { %3916 = vmatmul.mubr.msk.bf16.vlgmr.msra.gmra.mrb[0].mxu0 %vm165_vm1, %v141_v6  ;;  %v4017_v37 = vld [vmem:[#allocation9 + $0x6c] ss:$16 sps:$4 sm:$0xff]   ;;  %v4015_v38 = vld [vmem:[#allocation9 + $0x68] ss:$16 sps:$4 sm:$0xff]   ;;  %v4038_v45 = vld [vmem:[#allocation9 + $0xe4] ss:$16 sps:$4 sm:$0xff]  }
  0x9e   :  { %3924 = vmatpush3.bf16.msra.mxu1 %v3992_v7  ;;  %511 = vmatpush1.bf16.msra.mxu0 %v3994_v9  ;;  %v4023_v39 = vld [vmem:[#allocation9 + $0x8c] ss:$16 sps:$4 sm:$0xff]   ;;  %v4021_v40 = vld [vmem:[#allocation9 + $0x88] ss:$16 sps:$4 sm:$0xff]   ;;  %v4036_v47 = vld [vmem:[#allocation9 + $0xe0] ss:$16 sps:$4 sm:$0xff]  }
  0x9f   :  { %3925 = vmatprep.subr.bf16.mxu1 %v4436_v0  ;;  %512 = vmatprep.subr.bf16.mxu0 %v4002_v12  ;;  %v4029_v41 = vld [vmem:[#allocation9 + $0xac] ss:$16 sps:$4 sm:$0xff]   ;;  %v4027_v42 = vld [vmem:[#allocation9 + $0xa8] ss:$16 sps:$4 sm:$0xff]   ;;  %v604_v51 = vld [vmem:[#allocation10 + $0x20] sm:$0xff] }
  0xa0   :  { %v4035_v43 = vld [vmem:[#allocation9 + $0xcc] ss:$16 sps:$4 sm:$0xff]   ;;  %v4033_v44 = vld [vmem:[#allocation9 + $0xc8] ss:$16 sps:$4 sm:$0xff]   ;;  %542 = vmatprep.mubr.bf16.mxu0 %v4438_v49  ;;  %v602_v52 = vld [vmem:[#allocation10 + $0x10] sm:$0xff]  ;;  %v3519_v53 = vcombine.low %v600_v50, %v604_v51  ;;  %v3520_v54 = vcombine.high %v600_v50, %v604_v51 }
  0xa1   :  { %v4041_v46 = vld [vmem:[#allocation9 + $0xec] ss:$16 sps:$4 sm:$0xff]   ;;  %v4039_v48 = vld [vmem:[#allocation9 + $0xe8] ss:$16 sps:$4 sm:$0xff]   ;;  %v606_v55 = vld [vmem:[#allocation10 + $0x30] sm:$0xff] }
  0xa2   :  { %3926 = vmatpush3.bf16.msra.mxu1 %v3993_v8  ;;  %513 = vmatpush1.bf16.msra.mxu0 %v4000_v13  ;;  %v3523_v56 = vcombine.low %v602_v52, %v606_v55  ;;  %v3524_v57 = vcombine.high %v602_v52, %v606_v55  ;;  %v3481_v58 = vld [vmem:[#allocation7] ss:$0 sm:$0xff]  ;;  %v608_v62 = vld [vmem:[#allocation10 + $0x40] sm:$0xff]  ;;  %v610_v1 = vld [vmem:[#allocation10 + $0x50] sm:$0xff] }
  0xa3   :  { %551 = vmatprep.subr.bf16.mxu1 %v3999_v11  ;;  %514 = vmatprep.subr.bf16.mxu0 %v4008_v14  ;;  %v612_v0 = vld [vmem:[#allocation10 + $0x60] sm:$0xff]  ;;  %v614_v2 = vld [vmem:[#allocation10 + $0x70] sm:$0xff] }
  0xa4   :  { %v3528_v6 = vcombine.high %v608_v62, %v612_v0  ;;  %v3532_v7 = vcombine.high %v610_v1, %v614_v2  ;;  %v616_v8 = vld [vmem:[#allocation10 + $0x80] sm:$0xff]  ;;  %v618_v10 = vld [vmem:[#allocation10 + $0x90] sm:$0xff]  ;;  %v3527_v12 = vcombine.low %v608_v62, %v612_v0  ;;  %v3531_v13 = vcombine.low %v610_v1, %v614_v2 }
  0xa5   :  { %v620_v9 = vld [vmem:[#allocation10 + $0xa0] sm:$0xff]  ;;  %v622_v11 = vld [vmem:[#allocation10 + $0xb0] sm:$0xff] }
  0xa6   :  { %515 = vmatpush1.bf16.msra.mxu0 %v4006_v15  ;;  %v3536_v14 = vcombine.high %v616_v8, %v620_v9  ;;  %v3540_v15 = vcombine.high %v618_v10, %v622_v11  ;;  %v658_v50 = vld [vmem:[#allocation10 + $0x1d0] sm:$0xff]  ;;  %v672_v0 = vld [vmem:[#allocation10 + $0x240] sm:$0xff] }
  0xa7   :  { %516 = vmatprep.subr.bf16.mxu0 %v4014_v16  ;;  %v624_v16 = vld [vmem:[#allocation10 + $0xc0] sm:$0xff]  ;;  %v662_v51 = vld [vmem:[#allocation10 + $0x1f0] sm:$0xff] }
  0xa8   :  { %v3580_v55 = vcombine.high %v658_v50, %v662_v51  ;;  %v676_v1 = vld [vmem:[#allocation10 + $0x260] sm:$0xff]  ;;  %v674_v2 = vld [vmem:[#allocation10 + $0x250] sm:$0xff] }
  0xaa   :  { %517 = vmatpush1.bf16.msra.mxu0 %v4012_v17  ;;  %v628_v17 = vld [vmem:[#allocation10 + $0xe0] sm:$0xff] }
  0xab   :  { %518 = vmatprep.subr.bf16.mxu0 %v4020_v18  ;;  %v626_v18 = vld [vmem:[#allocation10 + $0xd0] sm:$0xff] }
  0xae   :  { %519 = vmatpush1.bf16.msra.mxu0 %v4018_v19  ;;  %v630_v19 = vld [vmem:[#allocation10 + $0xf0] sm:$0xff] }
  0xaf   :  { %520 = vmatprep.subr.bf16.mxu0 %v4026_v20  ;;  %v3535_v20 = vcombine.low %v616_v8, %v620_v9  ;;  %v680_v8 = vld [vmem:[#allocation10 + $0x280] sm:$0xff] }
  0xb0   :  { %v684_v9 = vld [vmem:[#allocation10 + $0x2a0] sm:$0xff] }
  0xb2   :  { %521 = vmatpush1.bf16.msra.mxu0 %v4024_v21  ;;  %v3539_v21 = vcombine.low %v618_v10, %v622_v11  ;;  %v682_v10 = vld [vmem:[#allocation10 + $0x290] sm:$0xff] }
  0xb3   :  { %522 = vmatprep.subr.bf16.mxu0 %v4032_v22  ;;  %v3544_v22 = vcombine.high %v624_v16, %v628_v17  ;;  %v686_v11 = vld [vmem:[#allocation10 + $0x2b0] sm:$0xff] }
  0xb6   :  { %523 = vmatpush1.bf16.msra.mxu0 %v4030_v23  ;;  %v3548_v23 = vcombine.high %v626_v18, %v630_v19 }
  0xb7   :  { %524 = vmatprep.subr.bf16.mxu0 %v4038_v45 }
  0xba   :  { %525 = vmatpush1.bf16.msra.mxu0 %v4036_v47 }
  0xbb   :  { %2342 = vmatprep.subr.bf16.mxu0 %v3524_v57  ;;  %v668_v57 = vld [vmem:[#allocation10 + $0x220] sm:$0xff] }
 0x170   :  { %v203_v25 = vpop.f32.mrb[0].mxu0 }
 0x171   :  { %v204_v26 = vadd.f32 %v3477_v24, %v203_v25  ;;  %v3917_v27 = vpop.f32.mrb[1].mxu0  ;;  %v632_v24 = vld [vmem:[#allocation10 + $0x100] sm:$0xff] }
 0x172   :  { %v206_v28 = vpop.f32.mrb[2].mxu0  ;;  %v636_v25 = vld [vmem:[#allocation10 + $0x120] sm:$0xff]  ;;  %v638_v27 = vld [vmem:[#allocation10 + $0x130] sm:$0xff] }
 0x173   :  { %v209_v29 = vmax.f32 %v204_v26, 0.0  ;;  %v3918_v30 = vpop.f32.mrb[3].mxu0  ;;  %v634_v26 = vld [vmem:[#allocation10 + $0x110] sm:$0xff]  ;;  %v3543_v28 = vcombine.low %v624_v16, %v628_v17  ;;  %v688_v16 = vld [vmem:[#allocation10 + $0x2c0] sm:$0xff] }
 0x174   :  { %v3552_v30 = vcombine.high %v632_v24, %v636_v25  ;;  %v692_v17 = vld [vmem:[#allocation10 + $0x2e0] sm:$0xff] }
 0x175   :  { %v210_v32 = vpack.c.bf16 %v209_v29, %v209_v29  ;;  %v3547_v29 = vcombine.low %v626_v18, %v630_v19  ;;  %v690_v18 = vld [vmem:[#allocation10 + $0x2d0] sm:$0xff] }
 0x176   :  { %v694_v19 = vld [vmem:[#allocation10 + $0x2f0] sm:$0xff] }
 0x177   :  { %3928 = vmatmul.mubr.msk.bf16.vlgmr.msra.gmra.mrb[0].mxu1 %vm250_vm2, %v210_v32  ;;  %v640_v32 = vld [vmem:[#allocation10 + $0x140] sm:$0xff] }
 0x178   :  { %552 = vmatpush1.bf16.msra.mxu1 %v3997_v31  ;;  %583 = vmatprep.mubr.bf16.mxu1 %v4438_v49  ;;  %v3556_v31 = vcombine.high %v634_v26, %v638_v27  ;;  %v660_v49 = vld [vmem:[#allocation10 + $0x1e0] sm:$0xff] }
 0x179   :  { %553 = vmatprep.subr.bf16.mxu1 %v4005_v33  ;;  %v644_v33 = vld [vmem:[#allocation10 + $0x160] sm:$0xff] }
 0x17c   :  { %554 = vmatpush1.bf16.msra.mxu1 %v4003_v34  ;;  %v642_v34 = vld [vmem:[#allocation10 + $0x150] sm:$0xff] }
 0x17d   :  { %555 = vmatprep.subr.bf16.mxu1 %v4011_v35  ;;  %v646_v35 = vld [vmem:[#allocation10 + $0x170] sm:$0xff] }
 0x17e   :  { %v3563_v45 = vcombine.low %v642_v34, %v646_v35 }
 0x180   :  { %556 = vmatpush1.bf16.msra.mxu1 %v4009_v36  ;;  %v3551_v36 = vcombine.low %v632_v24, %v636_v25  ;;  %v696_v24 = vld [vmem:[#allocation10 + $0x300] sm:$0xff] }
 0x181   :  { %557 = vmatprep.subr.bf16.mxu1 %v4017_v37  ;;  %v3555_v37 = vcombine.low %v634_v26, %v638_v27  ;;  %v700_v25 = vld [vmem:[#allocation10 + $0x320] sm:$0xff]  ;;  %v698_v26 = vld [vmem:[#allocation10 + $0x310] sm:$0xff] }
 0x182   :  { %v702_v27 = vld [vmem:[#allocation10 + $0x330] sm:$0xff] }
 0x184   :  { %558 = vmatpush1.bf16.msra.mxu1 %v4015_v38  ;;  %v3560_v38 = vcombine.high %v640_v32, %v644_v33 }
 0x185   :  { %559 = vmatprep.subr.bf16.mxu1 %v4023_v39  ;;  %v3564_v39 = vcombine.high %v642_v34, %v646_v35  ;;  %v706_v34 = vld [vmem:[#allocation10 + $0x350] sm:$0xff] }
 0x186   :  { %v710_v35 = vld [vmem:[#allocation10 + $0x370] sm:$0xff] }
 0x188   :  { %560 = vmatpush1.bf16.msra.mxu1 %v4021_v40  ;;  %v648_v40 = vld [vmem:[#allocation10 + $0x180] sm:$0xff] }
 0x189   :  { %561 = vmatprep.subr.bf16.mxu1 %v4029_v41  ;;  %v652_v41 = vld [vmem:[#allocation10 + $0x1a0] sm:$0xff] }
 0x18a   :  { %v3567_v52 = vcombine.low %v648_v40, %v652_v41 }
 0x18c   :  { %562 = vmatpush1.bf16.msra.mxu1 %v4027_v42  ;;  %v650_v42 = vld [vmem:[#allocation10 + $0x190] sm:$0xff] }
 0x18d   :  { %563 = vmatprep.subr.bf16.mxu1 %v4035_v43  ;;  %v654_v43 = vld [vmem:[#allocation10 + $0x1b0] sm:$0xff] }
 0x18e   :  { %v3572_v47 = vcombine.high %v650_v42, %v654_v43 }
 0x190   :  { %564 = vmatpush1.bf16.msra.mxu1 %v4033_v44  ;;  %v3559_v44 = vcombine.low %v640_v32, %v644_v33  ;;  %v704_v32 = vld [vmem:[#allocation10 + $0x340] sm:$0xff] }
 0x191   :  { %565 = vmatprep.subr.bf16.mxu1 %v4041_v46  ;;  %v3568_v46 = vcombine.high %v648_v40, %v652_v41  ;;  %v708_v33 = vld [vmem:[#allocation10 + $0x360] sm:$0xff]  ;;  %v3627_v41 = vcombine.low %v706_v34, %v710_v35 }
 0x192   :  { %v3623_v40 = vcombine.low %v704_v32, %v708_v33 }
 0x194   :  { %566 = vmatpush1.bf16.msra.mxu1 %v4039_v48  ;;  %v656_v48 = vld [vmem:[#allocation10 + $0x1c0] sm:$0xff] }
 0x195   :  { %2178 = vmatprep.subr.bf16.mxu1 %v3520_v54  ;;  %v3576_v54 = vcombine.high %v656_v48, %v660_v49 }
 0x24a   :  { %v288_v59 = vpop.f32.mrb[0].mxu1 }
 0x24b   :  { %v289_v60 = vadd.f32 %v3481_v58, %v288_v59  ;;  %v3929_v61 = vpop.f32.mrb[1].mxu1  ;;  %v666_v58 = vld [vmem:[#allocation10 + $0x210] sm:$0xff] }
 0x24c   :  { %v291_v63 = vpop.f32.mrb[2].mxu1  ;;  %v670_v59 = vld [vmem:[#allocation10 + $0x230] sm:$0xff]  ;;  %v3579_v61 = vcombine.low %v658_v50, %v662_v51  ;;  %v720_v50 = vld [vmem:[#allocation10 + $0x3c0] sm:$0xff] }
 0x24d   :  { %v294_v3 = vmax.f32 %v289_v60, 0.0  ;;  %v3930_v4 = vpop.f32.mrb[3].mxu1  ;;  %v3575_v60 = vcombine.low %v656_v48, %v660_v49  ;;  %v3588_v63 = vcombine.high %v666_v58, %v670_v59  ;;  %v724_v51 = vld [vmem:[#allocation10 + $0x3e0] sm:$0xff] }
 0x24f   :  { %v295_v5 = vpack.c.bf16 %v294_v3, %v294_v3  ;;  %v678_v3 = vld [vmem:[#allocation10 + $0x270] sm:$0xff] }
 0x251   :  { %543 = vmatmul.mubr.bf16.vlgmr.msra.gmra.mrb[4].mxu0 %v295_v5  ;;  %584 = vmatmul.mubr.bf16.vlgmr.msra.gmra.mrb[4].mxu1 %v295_v5  ;;  %v3587_v5 = vcombine.low %v666_v58, %v670_v59  ;;  %v728_v58 = vld [vmem:[#allocation10 + $0x400] sm:$0xff] }
 0x252   :  { %2179 = vmatpush1.bf16.msra.mxu1 %v3519_v53  ;;  %2343 = vmatpush1.bf16.msra.mxu0 %v3523_v56  ;;  %v3571_v53 = vcombine.low %v650_v42, %v654_v43  ;;  %v664_v56 = vld [vmem:[#allocation10 + $0x200] sm:$0xff] }
 0x253   :  { %2180 = vmatprep.subr.bf16.mxu1 %v3528_v6  ;;  %2344 = vmatprep.subr.bf16.mxu0 %v3532_v7  ;;  %v3584_v62 = vcombine.high %v664_v56, %v668_v57  ;;  %v3583_v4 = vcombine.low %v664_v56, %v668_v57  ;;  %v3592_v6 = vcombine.high %v672_v0, %v676_v1  ;;  %v712_v42 = vld [vmem:[#allocation10 + $0x380] sm:$0xff] }
 0x254   :  { %v3596_v7 = vcombine.high %v674_v2, %v678_v3  ;;  %v716_v43 = vld [vmem:[#allocation10 + $0x3a0] sm:$0xff] }
 0x255   :  { %v732_v59 = vld [vmem:[#allocation10 + $0x420] sm:$0xff] }
 0x256   :  { %2181 = vmatpush1.bf16.msra.mxu1 %v3527_v12  ;;  %2345 = vmatpush1.bf16.msra.mxu0 %v3531_v13  ;;  %v3591_v12 = vcombine.low %v672_v0, %v676_v1  ;;  %v3595_v13 = vcombine.low %v674_v2, %v678_v3  ;;  %v330_v2 = vlaneseq }
 0x257   :  { %2182 = vmatprep.subr.bf16.mxu1 %v3536_v14  ;;  %2346 = vmatprep.subr.bf16.mxu0 %v3540_v15  ;;  %v3600_v14 = vcombine.high %v680_v8, %v684_v9  ;;  %v3604_v15 = vcombine.high %v682_v10, %v686_v11 }
 0x258   :  { %v4608_v3 = vshrl.u32 %v330_v2, 7  ;;  %v776_v2 = vld [vmem:[#allocation10 + $0x580] sm:$0xff] }
 0x25a   :  { %2183 = vmatpush1.bf16.msra.mxu1 %v3535_v20  ;;  %2347 = vmatpush1.bf16.msra.mxu0 %v3539_v21  ;;  %v3599_v20 = vcombine.low %v680_v8, %v684_v9  ;;  %v3603_v21 = vcombine.low %v682_v10, %v686_v11 }
 0x25b   :  { %2184 = vmatprep.subr.bf16.mxu1 %v3544_v22  ;;  %2348 = vmatprep.subr.bf16.mxu0 %v3548_v23  ;;  %v3608_v22 = vcombine.high %v688_v16, %v692_v17  ;;  %v3612_v23 = vcombine.high %v690_v18, %v694_v19 }
 0x25e   :  { %2185 = vmatpush1.bf16.msra.mxu1 %v3543_v28  ;;  %2349 = vmatpush1.bf16.msra.mxu0 %v3547_v29  ;;  %v3607_v28 = vcombine.low %v688_v16, %v692_v17  ;;  %v3611_v29 = vcombine.low %v690_v18, %v694_v19 }
 0x25f   :  { %2186 = vmatprep.subr.bf16.mxu1 %v3552_v30  ;;  %2350 = vmatprep.subr.bf16.mxu0 %v3556_v31  ;;  %v3616_v30 = vcombine.high %v696_v24, %v700_v25  ;;  %v3620_v31 = vcombine.high %v698_v26, %v702_v27 }
 0x262   :  { %2187 = vmatpush1.bf16.msra.mxu1 %v3551_v36  ;;  %2351 = vmatpush1.bf16.msra.mxu0 %v3555_v37  ;;  %v3615_v36 = vcombine.low %v696_v24, %v700_v25  ;;  %v3619_v37 = vcombine.low %v698_v26, %v702_v27  ;;  %v736_v24 = vld [vmem:[#allocation10 + $0x440] sm:$0xff]  ;;  %v738_v27 = vld [vmem:[#allocation10 + $0x450] sm:$0xff] }
 0x263   :  { %2188 = vmatprep.subr.bf16.mxu1 %v3560_v38  ;;  %2352 = vmatprep.subr.bf16.mxu0 %v3564_v39  ;;  %v3624_v38 = vcombine.high %v704_v32, %v708_v33  ;;  %v3628_v39 = vcombine.high %v706_v34, %v710_v35  ;;  %v740_v26 = vld [vmem:[#allocation10 + $0x460] sm:$0xff]  ;;  %v746_v35 = vld [vmem:[#allocation10 + $0x490] sm:$0xff] }
 0x264   :  { %v3656_v32 = vcombine.high %v736_v24, %v740_v26  ;;  %v748_v34 = vld [vmem:[#allocation10 + $0x4a0] sm:$0xff] }
 0x266   :  { %2189 = vmatpush1.bf16.msra.mxu1 %v3559_v44  ;;  %2353 = vmatpush1.bf16.msra.mxu0 %v3563_v45  ;;  %v714_v44 = vld [vmem:[#allocation10 + $0x390] sm:$0xff]  ;;  %v3632_v45 = vcombine.high %v712_v42, %v716_v43 }
 0x267   :  { %2190 = vmatprep.subr.bf16.mxu1 %v3568_v46  ;;  %2354 = vmatprep.subr.bf16.mxu0 %v3572_v47  ;;  %v718_v46 = vld [vmem:[#allocation10 + $0x3b0] sm:$0xff]  ;;  %v3631_v47 = vcombine.low %v712_v42, %v716_v43  ;;  %v752_v42 = vld [vmem:[#allocation10 + $0x4c0] sm:$0xff] }
 0x268   :  { %v3635_v48 = vcombine.low %v714_v44, %v718_v46  ;;  %v3636_v49 = vcombine.high %v714_v44, %v718_v46  ;;  %v756_v43 = vld [vmem:[#allocation10 + $0x4e0] sm:$0xff]  ;;  %v754_v44 = vld [vmem:[#allocation10 + $0x4d0] sm:$0xff] }
 0x26a   :  { %2191 = vmatpush1.bf16.msra.mxu1 %v3567_v52  ;;  %2355 = vmatpush1.bf16.msra.mxu0 %v3571_v53  ;;  %v722_v52 = vld [vmem:[#allocation10 + $0x3d0] sm:$0xff]  ;;  %v3640_v53 = vcombine.high %v720_v50, %v724_v51 }
 0x26b   :  { %2192 = vmatprep.subr.bf16.mxu1 %v3576_v54  ;;  %2356 = vmatprep.subr.bf16.mxu0 %v3580_v55  ;;  %v726_v54 = vld [vmem:[#allocation10 + $0x3f0] sm:$0xff]  ;;  %v3639_v55 = vcombine.low %v720_v50, %v724_v51  ;;  %v760_v50 = vld [vmem:[#allocation10 + $0x500] sm:$0xff] }
 0x26c   :  { %v3643_v56 = vcombine.low %v722_v52, %v726_v54  ;;  %v3644_v57 = vcombine.high %v722_v52, %v726_v54  ;;  %v764_v51 = vld [vmem:[#allocation10 + $0x520] sm:$0xff]  ;;  %v762_v52 = vld [vmem:[#allocation10 + $0x510] sm:$0xff]  ;;  %v3671_v54 = vcombine.low %v752_v42, %v756_v43 }
 0x26e   :  { %2193 = vmatpush1.bf16.msra.mxu1 %v3575_v60  ;;  %2357 = vmatpush1.bf16.msra.mxu0 %v3579_v61  ;;  %v730_v60 = vld [vmem:[#allocation10 + $0x410] sm:$0xff]  ;;  %v3648_v61 = vcombine.high %v728_v58, %v732_v59 }
 0x26f   :  { %2194 = vmatprep.subr.bf16.mxu1 %v3584_v62  ;;  %2358 = vmatprep.subr.bf16.mxu0 %v3588_v63  ;;  %v734_v62 = vld [vmem:[#allocation10 + $0x430] sm:$0xff]  ;;  %v3647_v63 = vcombine.low %v728_v58, %v732_v59  ;;  %v768_v58 = vld [vmem:[#allocation10 + $0x540] sm:$0xff] }
 0x270   :  { %v3651_v0 = vcombine.low %v730_v60, %v734_v62  ;;  %v3652_v1 = vcombine.high %v730_v60, %v734_v62  ;;  %v772_v59 = vld [vmem:[#allocation10 + $0x560] sm:$0xff]  ;;  %v770_v60 = vld [vmem:[#allocation10 + $0x550] sm:$0xff]  ;;  %v3679_v62 = vcombine.low %v760_v50, %v764_v51 }
 0x272   :  { %2195 = vmatpush1.bf16.msra.mxu1 %v3583_v4  ;;  %2359 = vmatpush1.bf16.msra.mxu0 %v3587_v5  ;;  %v4611_v4 = vsub.s32 0, %v4608_v3  ;;  %v4616_v5 = vld [vmem:[%s4703_s6] sm:$0xf] }
 0x273   :  { %2196 = vmatprep.subr.bf16.mxu1 %v3592_v6  ;;  %2360 = vmatprep.subr.bf16.mxu0 %v3596_v7  ;;  %v4619_v6 = vsub.s32 1, %v4608_v3  ;;  %v344_v7 = vsub.s32 3, %v4608_v3 }
 0x274   :  { %v333_v8 = vrot.slane %v4616_v5, %v4611_v4 }
 0x275   :  { %v337_v9 = vrot.slane %v4616_v5, %v4619_v6  ;;  %v345_v10 = vrot.slane %v4616_v5, %v344_v7 }
 0x276   :  { %2197 = vmatpush1.bf16.msra.mxu1 %v3591_v12  ;;  %2361 = vmatpush1.bf16.msra.mxu0 %v3595_v13 }
 0x277   :  { %2198 = vmatprep.subr.bf16.mxu1 %v3600_v14  ;;  %2362 = vmatprep.subr.bf16.mxu0 %v3604_v15 }
 0x27a   :  { %2199 = vmatpush1.bf16.msra.mxu1 %v3599_v20  ;;  %2363 = vmatpush1.bf16.msra.mxu0 %v3603_v21 }
 0x27b   :  { %2200 = vmatprep.subr.bf16.mxu1 %v3608_v22  ;;  %2364 = vmatprep.subr.bf16.mxu0 %v3612_v23 }
 0x27e   :  { %2201 = vmatpush1.bf16.msra.mxu1 %v3607_v28  ;;  %2365 = vmatpush1.bf16.msra.mxu0 %v3611_v29  ;;  %v742_v28 = vld [vmem:[#allocation10 + $0x470] sm:$0xff] }
 0x27f   :  { %2202 = vmatprep.subr.bf16.mxu1 %v3616_v30  ;;  %2366 = vmatprep.subr.bf16.mxu0 %v3620_v31  ;;  %v744_v31 = vld [vmem:[#allocation10 + $0x480] sm:$0xff]  ;;  %v3660_v33 = vcombine.high %v738_v27, %v742_v28 }
 0x280   :  { %v3663_v46 = vcombine.low %v744_v31, %v748_v34 }
 0x282   :  { %2203 = vmatpush1.bf16.msra.mxu1 %v3615_v36  ;;  %2367 = vmatpush1.bf16.msra.mxu0 %v3619_v37  ;;  %v750_v36 = vld [vmem:[#allocation10 + $0x4b0] sm:$0xff] }
 0x283   :  { %2204 = vmatprep.subr.bf16.mxu1 %v3624_v38  ;;  %2368 = vmatprep.subr.bf16.mxu0 %v3628_v39  ;;  %v3655_v38 = vcombine.low %v736_v24, %v740_v26  ;;  %v3659_v39 = vcombine.low %v738_v27, %v742_v28  ;;  %v792_v24 = vld [vmem:[#allocation10 + $0x600] sm:$0xff]  ;;  %v794_v26 = vld [vmem:[#allocation10 + $0x610] sm:$0xff] }
 0x284   :  { %v798_v27 = vld [vmem:[#allocation10 + $0x630] sm:$0xff] }
 0x286   :  { %2205 = vmatpush1.bf16.msra.mxu1 %v3623_v40  ;;  %2369 = vmatpush1.bf16.msra.mxu0 %v3627_v41  ;;  %v3664_v40 = vcombine.high %v744_v31, %v748_v34  ;;  %v3668_v41 = vcombine.high %v746_v35, %v750_v36  ;;  %v800_v34 = vld [vmem:[#allocation10 + $0x640] sm:$0xff] }
 0x287   :  { %2206 = vmatprep.subr.bf16.mxu1 %v3632_v45  ;;  %2370 = vmatprep.subr.bf16.mxu0 %v3636_v49  ;;  %v758_v45 = vld [vmem:[#allocation10 + $0x4f0] sm:$0xff] }
 0x288   :  { %v3676_v49 = vcombine.high %v754_v44, %v758_v45 }
 0x28a   :  { %2207 = vmatpush1.bf16.msra.mxu1 %v3631_v47  ;;  %2371 = vmatpush1.bf16.msra.mxu0 %v3635_v48  ;;  %v3667_v47 = vcombine.low %v746_v35, %v750_v36  ;;  %v3672_v48 = vcombine.high %v752_v42, %v756_v43  ;;  %v804_v35 = vld [vmem:[#allocation10 + $0x660] sm:$0xff]  ;;  %v802_v36 = vld [vmem:[#allocation10 + $0x650] sm:$0xff] }
 0x28b   :  { %2208 = vmatprep.subr.bf16.mxu1 %v3640_v53  ;;  %2372 = vmatprep.subr.bf16.mxu0 %v3644_v57  ;;  %v766_v53 = vld [vmem:[#allocation10 + $0x530] sm:$0xff]  ;;  %v808_v43 = vld [vmem:[#allocation10 + $0x680] sm:$0xff] }
 0x28c   :  { %v3684_v57 = vcombine.high %v762_v52, %v766_v53 }
 0x28e   :  { %2209 = vmatpush1.bf16.msra.mxu1 %v3639_v55  ;;  %2373 = vmatpush1.bf16.msra.mxu0 %v3643_v56  ;;  %v3675_v55 = vcombine.low %v754_v44, %v758_v45  ;;  %v3680_v56 = vcombine.high %v760_v50, %v764_v51  ;;  %v812_v44 = vld [vmem:[#allocation10 + $0x6a0] sm:$0xff]  ;;  %v810_v45 = vld [vmem:[#allocation10 + $0x690] sm:$0xff] }
 0x28f   :  { %2219 = vmatprep.subr.bf16.mxu1 %v3648_v61  ;;  %2383 = vmatprep.subr.bf16.mxu0 %v3652_v1  ;;  %v774_v61 = vld [vmem:[#allocation10 + $0x570] sm:$0xff]  ;;  %v816_v51 = vld [vmem:[#allocation10 + $0x6c0] sm:$0xff] }
 0x290   :  { %v3692_v1 = vcombine.high %v770_v60, %v774_v61 }
 0x324   :  { %v544_v11 = vpop.f32.mrb[4].mxu0  ;;  %v4629_v12 = vpop.f32.mrb[4].mxu1 }
 0x325   :  { %v545_v13 = vadd.f32 %v544_v11, %v333_v8  ;;  %v546_v14 = vpop.f32.mrb[5].mxu0  ;;  %v587_v15 = vpop.f32.mrb[5].mxu1  ;;  %v780_v8 = vld [vmem:[#allocation10 + $0x5a0] sm:$0xff]  ;;  %v3687_v11 = vcombine.low %v768_v58, %v772_v59 }
 0x326   :  { %v547_v16 = vadd.f32 %v546_v14, %v337_v9  ;;  %v588_v17 = vadd.f32 %v587_v15, %v345_v10  ;;  %v548_v18 = vpop.f32.mrb[6].mxu0  ;;  %v589_v19 = vpop.f32.mrb[6].mxu1  ;;  %v778_v9 = vld [vmem:[#allocation10 + $0x590] sm:$0xff]  ;;  %v3696_v14 = vcombine.high %v776_v2, %v780_v8 }
 0x327   :  { %v592_v20 = vmax.f32 %v545_v13, 0.0  ;;  %v549_v21 = vpop.f32.mrb[7].mxu0  ;;  %v590_v22 = vpop.f32.mrb[7].mxu1  ;;  %v782_v10 = vld [vmem:[#allocation10 + $0x5b0] sm:$0xff]  ;;  %v3691_v13 = vcombine.low %v770_v60, %v774_v61  ;;  %v828_v60 = vld [vmem:[#allocation10 + $0x720] sm:$0xff] }
 0x328   :  { %v593_v23 = vmax.f32 %v547_v16, 0.0  ;;  %v595_v25 = vmax.f32 %v588_v17, 0.0  ;;  %v3700_v15 = vcombine.high %v778_v9, %v782_v10  ;;  %v784_v16 = vld [vmem:[#allocation10 + $0x5c0] sm:$0xff]  ;;  %v786_v18 = vld [vmem:[#allocation10 + $0x5d0] sm:$0xff]  ;;  %v3699_v21 = vcombine.low %v778_v9, %v782_v10 }
 0x329   :  { %v4633_v30 = vpack.c.bf16 %v592_v20, %v592_v20  ;;  %v788_v17 = vld [vmem:[#allocation10 + $0x5e0] sm:$0xff]  ;;  %v790_v19 = vld [vmem:[#allocation10 + $0x5f0] sm:$0xff]  ;;  %v3695_v20 = vcombine.low %v776_v2, %v780_v8 }
 0x32a   :  { %v4631_v29 = vpack.c.bf16 %v593_v23, %v593_v23  ;;  %v4637_v37 = vpack.c.bf16 %v595_v25, %v595_v25  ;;  %v3704_v22 = vcombine.high %v784_v16, %v788_v17  ;;  %v3708_v23 = vcombine.high %v786_v18, %v790_v19  ;;  %v796_v25 = vld [vmem:[#allocation10 + $0x620] sm:$0xff]  ;;  %v826_v61 = vld [vmem:[#allocation10 + $0x710] sm:$0xff] }
 0x32b   :  { %v3703_v28 = vcombine.low %v784_v16, %v788_v17  ;;  %v3707_v31 = vcombine.low %v786_v18, %v790_v19  ;;  %v832_v8 = vld [vmem:[#allocation10 + $0x740] sm:$0xff]  ;;  %v834_v10 = vld [vmem:[#allocation10 + $0x750] sm:$0xff] }
 0x32c   :  { %2210 = vmatprep.mubr.bf16.mxu1 %v4631_v29  ;;  %2374 = vmatprep.mubr.bf16.mxu0 %v4631_v29  ;;  %v836_v9 = vld [vmem:[#allocation10 + $0x760] sm:$0xff] }
 0x32d   :  { %2211 = vmatmul.mubr.bf16.vlgmr.msra.gmra.mrb[8].mxu1 %v4633_v30  ;;  %2375 = vmatmul.mubr.bf16.vlgmr.msra.gmra.mrb[8].mxu0 %v4633_v30  ;;  %v3752_v16 = vcombine.high %v832_v8, %v836_v9  ;;  %v840_v18 = vld [vmem:[#allocation10 + $0x780] sm:$0xff] }
 0x32e   :  { %2220 = vmatpush1.bf16.msra.mxu1 %v3647_v63  ;;  %2384 = vmatpush1.bf16.msra.mxu0 %v3651_v0  ;;  %v3683_v63 = vcombine.low %v762_v52, %v766_v53  ;;  %v3688_v0 = vcombine.high %v768_v58, %v772_v59  ;;  %v820_v52 = vld [vmem:[#allocation10 + $0x6e0] sm:$0xff]  ;;  %v818_v53 = vld [vmem:[#allocation10 + $0x6d0] sm:$0xff] }
 0x32f   :  { %2251 = vmatprep.mubr.bf16.mxu1 %v4637_v37  ;;  %2415 = vmatprep.mubr.bf16.mxu0 %v4637_v37  ;;  %v824_v59 = vld [vmem:[#allocation10 + $0x700] sm:$0xff] }
 0x330   :  { %2221 = vmatprep.subr.bf16.mxu1 %v3656_v32  ;;  %2385 = vmatprep.subr.bf16.mxu0 %v3660_v33  ;;  %v3712_v32 = vcombine.high %v792_v24, %v796_v25  ;;  %v3716_v33 = vcombine.high %v794_v26, %v798_v27  ;;  %v844_v19 = vld [vmem:[#allocation10 + $0x7a0] sm:$0xff] }
 0x332   :  { %2222 = vmatpush1.bf16.msra.mxu1 %v3655_v38  ;;  %2386 = vmatpush1.bf16.msra.mxu0 %v3659_v39  ;;  %v806_v38 = vld [vmem:[#allocation10 + $0x670] sm:$0xff]  ;;  %v3711_v39 = vcombine.low %v792_v24, %v796_v25  ;;  %v3760_v25 = vcombine.high %v840_v18, %v844_v19 }
 0x333   :  { %2223 = vmatprep.subr.bf16.mxu1 %v3664_v40  ;;  %2387 = vmatprep.subr.bf16.mxu0 %v3668_v41  ;;  %v3715_v40 = vcombine.low %v794_v26, %v798_v27  ;;  %v3720_v41 = vcombine.high %v800_v34, %v804_v35  ;;  %v3724_v42 = vcombine.high %v802_v36, %v806_v38  ;;  %v848_v27 = vld [vmem:[#allocation10 + $0x7c0] sm:$0xff] }
 0x336   :  { %2224 = vmatpush1.bf16.msra.mxu1 %v3663_v46  ;;  %2388 = vmatpush1.bf16.msra.mxu0 %v3667_v47  ;;  %v814_v46 = vld [vmem:[#allocation10 + $0x6b0] sm:$0xff]  ;;  %v3719_v47 = vcombine.low %v800_v34, %v804_v35 }
 0x337   :  { %2225 = vmatprep.subr.bf16.mxu1 %v3672_v48  ;;  %2389 = vmatprep.subr.bf16.mxu0 %v3676_v49  ;;  %v3723_v48 = vcombine.low %v802_v36, %v806_v38  ;;  %v3728_v49 = vcombine.high %v808_v43, %v812_v44  ;;  %v3732_v50 = vcombine.high %v810_v45, %v814_v46 }
 0x33a   :  { %2226 = vmatpush1.bf16.msra.mxu1 %v3671_v54  ;;  %2390 = vmatpush1.bf16.msra.mxu0 %v3675_v55  ;;  %v822_v54 = vld [vmem:[#allocation10 + $0x6f0] sm:$0xff]  ;;  %v3727_v55 = vcombine.low %v808_v43, %v812_v44  ;;  %v609_v44 = vld [vmem:[#allocation10 + $0x48] sm:$0xff] }
 0x33b   :  { %2227 = vmatprep.subr.bf16.mxu1 %v3680_v56  ;;  %2391 = vmatprep.subr.bf16.mxu0 %v3684_v57  ;;  %v3731_v56 = vcombine.low %v810_v45, %v814_v46  ;;  %v3736_v57 = vcombine.high %v816_v51, %v820_v52  ;;  %v3740_v58 = vcombine.high %v818_v53, %v822_v54  ;;  %v613_v45 = vld [vmem:[#allocation10 + $0x68] sm:$0xff] }
 0x33e   :  { %2228 = vmatpush1.bf16.msra.mxu1 %v3679_v62  ;;  %2392 = vmatpush1.bf16.msra.mxu0 %v3683_v63  ;;  %v830_v62 = vld [vmem:[#allocation10 + $0x730] sm:$0xff]  ;;  %v3735_v63 = vcombine.low %v816_v51, %v820_v52  ;;  %v625_v52 = vld [vmem:[#allocation10 + $0xc8] sm:$0xff] }
 0x33f   :  { %2229 = vmatprep.subr.bf16.mxu1 %v3688_v0  ;;  %2393 = vmatprep.subr.bf16.mxu0 %v3692_v1  ;;  %v3739_v0 = vcombine.low %v818_v53, %v822_v54  ;;  %v3744_v1 = vcombine.high %v824_v59, %v828_v60  ;;  %v3748_v2 = vcombine.high %v826_v61, %v830_v62  ;;  %v629_v53 = vld [vmem:[#allocation10 + $0xe8] sm:$0xff] }
 0x342   :  { %2230 = vmatpush1.bf16.msra.mxu1 %v3687_v11  ;;  %2394 = vmatpush1.bf16.msra.mxu0 %v3691_v13  ;;  %v838_v11 = vld [vmem:[#allocation10 + $0x770] sm:$0xff]  ;;  %v3743_v13 = vcombine.low %v824_v59, %v828_v60  ;;  %v641_v60 = vld [vmem:[#allocation10 + $0x148] sm:$0xff] }
 0x343   :  { %2231 = vmatprep.subr.bf16.mxu1 %v3696_v14  ;;  %2395 = vmatprep.subr.bf16.mxu0 %v3700_v15  ;;  %v3747_v14 = vcombine.low %v826_v61, %v830_v62  ;;  %v340_v15 = vsub.s32 2, %v4608_v3  ;;  %v3756_v17 = vcombine.high %v834_v10, %v838_v11  ;;  %v645_v61 = vld [vmem:[#allocation10 + $0x168] sm:$0xff] }
 0x345   :  { %v341_v24 = vrot.slane %v4616_v5, %v340_v15  ;;  %v605_v5 = vld [vmem:[#allocation10 + $0x28] sm:$0xff] }
 0x346   :  { %2232 = vmatpush1.bf16.msra.mxu1 %v3695_v20  ;;  %2396 = vmatpush1.bf16.msra.mxu0 %v3699_v21  ;;  %v842_v20 = vld [vmem:[#allocation10 + $0x790] sm:$0xff] }
 0x347   :  { %2233 = vmatprep.subr.bf16.mxu1 %v3704_v22  ;;  %2397 = vmatprep.subr.bf16.mxu0 %v3708_v23  ;;  %v846_v21 = vld [vmem:[#allocation10 + $0x7b0] sm:$0xff]  ;;  %v3751_v22 = vcombine.low %v832_v8, %v836_v9  ;;  %v3755_v23 = vcombine.low %v834_v10, %v838_v11  ;;  %v586_v35 = vadd.f32 %v4629_v12, %v341_v24  ;;  %v657_v9 = vld [vmem:[#allocation10 + $0x1c8] sm:$0xff] }
 0x348   :  { %v3764_v26 = vcombine.high %v842_v20, %v846_v21  ;;  %v3763_v34 = vcombine.low %v842_v20, %v846_v21  ;;  %v661_v10 = vld [vmem:[#allocation10 + $0x1e8] sm:$0xff] }
 0x349   :  { %v4044_v20 = vld [vmem:[#allocation13 + $0x4] ss:$8 sps:$4 sm:$0xff]  }
 0x34a   :  { %2234 = vmatpush1.bf16.msra.mxu1 %v3703_v28  ;;  %2398 = vmatpush1.bf16.msra.mxu0 %v3707_v31  ;;  %v852_v28 = vld [vmem:[#allocation10 + $0x7e0] sm:$0xff]  ;;  %v850_v31 = vld [vmem:[#allocation10 + $0x7d0] sm:$0xff]  ;;  %v673_v21 = vld [vmem:[#allocation10 + $0x248] sm:$0xff] }
 0x34b   :  { %2235 = vmatprep.subr.bf16.mxu1 %v3712_v32  ;;  %2399 = vmatprep.subr.bf16.mxu0 %v3716_v33  ;;  %v854_v32 = vld [vmem:[#allocation10 + $0x7f0] sm:$0xff]  ;;  %v3759_v33 = vcombine.low %v840_v18, %v844_v19  ;;  %v3768_v36 = vcombine.high %v848_v27, %v852_v28 }
 0x34c   :  { %v3772_v38 = vcombine.high %v850_v31, %v854_v32  ;;  %v4042_v19 = vld [vmem:[#allocation13] ss:$8 sps:$4 sm:$0xff]  }
 0x34e   :  { %2236 = vmatpush1.bf16.msra.mxu1 %v3711_v39  ;;  %2400 = vmatpush1.bf16.msra.mxu0 %v3715_v40  ;;  %v601_v39 = vld [vmem:[#allocation10 + $0x8] sm:$0xff]  ;;  %v3767_v40 = vcombine.low %v848_v27, %v852_v28 }
 0x34f   :  { %2237 = vmatprep.subr.bf16.mxu1 %v3720_v41  ;;  %2401 = vmatprep.subr.bf16.mxu0 %v3724_v42  ;;  %v3771_v41 = vcombine.low %v850_v31, %v854_v32  ;;  %v594_v42 = vmax.f32 %v586_v35, 0.0  ;;  %v3522_v43 = vcombine.high %v601_v39, %v605_v5  ;;  %v3521_v46 = vcombine.low %v601_v39, %v605_v5  ;;  %v681_v27 = vld [vmem:[#allocation10 + $0x288] sm:$0xff]  ;;  %v4051_v5 = vld [vmem:[#allocation13 + $0x30] ss:$8 sps:$4 sm:$0xff]  }
 0x350   :  { %v685_v28 = vld [vmem:[#allocation10 + $0x2a8] sm:$0xff] }
 0x351   :  { %v4648_v12 = vpack.c.bf16 %v594_v42, %v594_v42  ;;  %v3602_v32 = vcombine.high %v681_v27, %v685_v28  ;;  %v689_v35 = vld [vmem:[#allocation10 + $0x2c8] sm:$0xff] }
 0x352   :  { %2238 = vmatpush1.bf16.msra.mxu1 %v3719_v47  ;;  %2402 = vmatpush1.bf16.msra.mxu0 %v3723_v48  ;;  %v3530_v47 = vcombine.high %v609_v44, %v613_v45  ;;  %v617_v48 = vld [vmem:[#allocation10 + $0x88] sm:$0xff] }
 0x353   :  { %2239 = vmatprep.subr.bf16.mxu1 %v3728_v49  ;;  %2403 = vmatprep.subr.bf16.mxu0 %v3732_v50  ;;  %v621_v49 = vld [vmem:[#allocation10 + $0xa8] sm:$0xff]  ;;  %v3529_v50 = vcombine.low %v609_v44, %v613_v45 }
 0x354   :  { %v3538_v51 = vcombine.high %v617_v48, %v621_v49  ;;  %v3537_v54 = vcombine.low %v617_v48, %v621_v49  ;;  %v701_v42 = vld [vmem:[#allocation10 + $0x328] sm:$0xff] }
 0x355   :  { %v4054_v45 = vld [vmem:[#allocation13 + $0x40] ss:$8 sps:$4 sm:$0xff]  }
 0x356   :  { %2240 = vmatpush1.bf16.msra.mxu1 %v3727_v55  ;;  %2404 = vmatpush1.bf16.msra.mxu0 %v3731_v56  ;;  %v3546_v55 = vcombine.high %v625_v52, %v629_v53  ;;  %v633_v56 = vld [vmem:[#allocation10 + $0x108] sm:$0xff] }
 0x357   :  { %2241 = vmatprep.subr.bf16.mxu1 %v3736_v57  ;;  %2405 = vmatprep.subr.bf16.mxu0 %v3740_v58  ;;  %v637_v57 = vld [vmem:[#allocation10 + $0x128] sm:$0xff]  ;;  %v3545_v58 = vcombine.low %v625_v52, %v629_v53  ;;  %v4059_v52 = vld [vmem:[#allocation13 + $0x54] ss:$8 sps:$4 sm:$0xff]  }
 0x358   :  { %v3554_v59 = vcombine.high %v633_v56, %v637_v57  ;;  %v3553_v62 = vcombine.low %v633_v56, %v637_v57  ;;  %v709_v48 = vld [vmem:[#allocation10 + $0x368] sm:$0xff] }
 0x359   :  { %v713_v53 = vld [vmem:[#allocation10 + $0x388] sm:$0xff] }
 0x35a   :  { %2242 = vmatpush1.bf16.msra.mxu1 %v3735_v63  ;;  %2406 = vmatpush1.bf16.msra.mxu0 %v3739_v0  ;;  %v3562_v63 = vcombine.high %v641_v60, %v645_v61  ;;  %v649_v0 = vld [vmem:[#allocation10 + $0x188] sm:$0xff] }
 0x35b   :  { %2243 = vmatprep.subr.bf16.mxu1 %v3744_v1  ;;  %2407 = vmatprep.subr.bf16.mxu0 %v3748_v2  ;;  %v653_v1 = vld [vmem:[#allocation10 + $0x1a8] sm:$0xff]  ;;  %v3561_v2 = vcombine.low %v641_v60, %v645_v61 }
 0x35c   :  { %v3570_v8 = vcombine.high %v649_v0, %v653_v1  ;;  %v3569_v11 = vcombine.low %v649_v0, %v653_v1  ;;  %v4060_v57 = vld [vmem:[#allocation13 + $0x60] ss:$8 sps:$4 sm:$0xff]   ;;  %v4065_v0 = vld [vmem:[#allocation13 + $0x74] ss:$8 sps:$4 sm:$0xff]  }
 0x35d   :  { %v725_v60 = vld [vmem:[#allocation10 + $0x3e8] sm:$0xff] }
 0x35e   :  { %2244 = vmatpush1.bf16.msra.mxu1 %v3743_v13  ;;  %2408 = vmatpush1.bf16.msra.mxu0 %v3747_v14  ;;  %v3578_v13 = vcombine.high %v657_v9, %v661_v10  ;;  %v665_v14 = vld [vmem:[#allocation10 + $0x208] sm:$0xff] }
 0x35f   :  { %2245 = vmatprep.subr.bf16.mxu1 %v3752_v16  ;;  %2409 = vmatprep.subr.bf16.mxu0 %v3756_v17  ;;  %v669_v16 = vld [vmem:[#allocation10 + $0x228] sm:$0xff]  ;;  %v3577_v17 = vcombine.low %v657_v9, %v661_v10 }
 0x360   :  { %v3586_v18 = vcombine.high %v665_v14, %v669_v16  ;;  %v729_v1 = vld [vmem:[#allocation10 + $0x408] sm:$0xff] }
 0x361   :  { %v4066_v10 = vld [vmem:[#allocation13 + $0x80] ss:$8 sps:$4 sm:$0xff]  }
 0x362   :  { %2246 = vmatpush1.bf16.msra.mxu1 %v3751_v22  ;;  %2410 = vmatpush1.bf16.msra.mxu0 %v3755_v23  ;;  %v677_v22 = vld [vmem:[#allocation10 + $0x268] sm:$0xff]  ;;  %v3585_v23 = vcombine.low %v665_v14, %v669_v16 }
 0x363   :  { %2247 = vmatprep.subr.bf16.mxu1 %v3760_v25  ;;  %2411 = vmatprep.subr.bf16.mxu0 %v3764_v26  ;;  %v3594_v24 = vcombine.high %v673_v21, %v677_v22  ;;  %v4045_v25 = vld [vmem:[#allocation13 + $0x10] ss:$8 sps:$4 sm:$0xff]   ;;  %v4047_v26 = vld [vmem:[#allocation13 + $0x14] ss:$8 sps:$4 sm:$0xff]   ;;  %v3593_v31 = vcombine.low %v673_v21, %v677_v22  ;;  %v741_v14 = vld [vmem:[#allocation10 + $0x468] sm:$0xff] }
 0x364   :  { %v4069_v21 = vld [vmem:[#allocation13 + $0x90] ss:$8 sps:$4 sm:$0xff]  }
 0x366   :  { %2248 = vmatpush1.bf16.msra.mxu1 %v3759_v33  ;;  %2412 = vmatpush1.bf16.msra.mxu0 %v3763_v34  ;;  %v4048_v33 = vld [vmem:[#allocation13 + $0x20] ss:$8 sps:$4 sm:$0xff]   ;;  %v4050_v34 = vld [vmem:[#allocation13 + $0x24] ss:$8 sps:$4 sm:$0xff]  }
 0x367   :  { %2249 = vmatprep.subr.bf16.mxu1 %v3768_v36  ;;  %2413 = vmatprep.subr.bf16.mxu0 %v3772_v38  ;;  %v693_v36 = vld [vmem:[#allocation10 + $0x2e8] sm:$0xff]  ;;  %v3601_v38 = vcombine.low %v681_v27, %v685_v28 }
 0x368   :  { %v3610_v39 = vcombine.high %v689_v35, %v693_v36  ;;  %v757_v27 = vld [vmem:[#allocation10 + $0x4e8] sm:$0xff] }
 0x36a   :  { %2250 = vmatpush1.bf16.msra.mxu1 %v3767_v40  ;;  %2414 = vmatpush1.bf16.msra.mxu0 %v3771_v41  ;;  %v4053_v40 = vld [vmem:[#allocation13 + $0x34] ss:$8 sps:$4 sm:$0xff]   ;;  %v697_v41 = vld [vmem:[#allocation10 + $0x308] sm:$0xff] }
 0x36b   :  { %2260 = vmatprep.subr.bf16.mxu1 %v3522_v43  ;;  %3302 = vmatprep.subr.bf16.mxu0 %v4044_v20  ;;  %v3609_v43 = vcombine.low %v689_v35, %v693_v36  ;;  %v3618_v44 = vcombine.high %v697_v41, %v701_v42  ;;  %v3617_v49 = vcombine.low %v697_v41, %v701_v42  ;;  %v749_v20 = vld [vmem:[#allocation10 + $0x4a8] sm:$0xff] }
 0x36c   :  { %v765_v35 = vld [vmem:[#allocation10 + $0x528] sm:$0xff] }
 0x36d   :  { %2252 = vmatmul.mubr.bf16.vlgmr.msra.gmra.mrb[8].mxu1 %v4648_v12  ;;  %2416 = vmatmul.mubr.bf16.vlgmr.msra.gmra.mrb[8].mxu0 %v4648_v12  ;;  %v773_v41 = vld [vmem:[#allocation10 + $0x568] sm:$0xff] }
 0x36e   :  { %2261 = vmatpush1.bf16.msra.mxu1 %v3521_v46  ;;  %2292 = vmatprep.mubr.bf16.mxu1 %v4631_v29  ;;  %v4056_v46 = vld [vmem:[#allocation13 + $0x44] ss:$8 sps:$4 sm:$0xff]  }
 0x36f   :  { %2262 = vmatprep.subr.bf16.mxu1 %v3530_v47  ;;  %3303 = vmatpush1.bf16.msra.mxu0 %v4042_v19  ;;  %v705_v47 = vld [vmem:[#allocation10 + $0x348] sm:$0xff] }
 0x370   :  { %3304 = vmatprep.subr.bf16.mxu0 %v4047_v26  ;;  %v745_v19 = vld [vmem:[#allocation10 + $0x488] sm:$0xff] }
 0x371   :  { %v753_v26 = vld [vmem:[#allocation10 + $0x4c8] sm:$0xff]  ;;  %v3665_v28 = vcombine.low %v745_v19, %v749_v20 }
 0x372   :  { %2263 = vmatpush1.bf16.msra.mxu1 %v3529_v50  ;;  %v3626_v50 = vcombine.high %v705_v47, %v709_v48  ;;  %v3673_v36 = vcombine.low %v753_v26, %v757_v27 }
 0x373   :  { %2264 = vmatprep.subr.bf16.mxu1 %v3538_v51  ;;  %3305 = vmatpush1.bf16.msra.mxu0 %v4045_v25  ;;  %v4057_v51 = vld [vmem:[#allocation13 + $0x50] ss:$8 sps:$4 sm:$0xff]   ;;  %v4074_v25 = vld [vmem:[#allocation13 + $0xa4] ss:$8 sps:$4 sm:$0xff]  }
 0x374   :  { %3306 = vmatprep.subr.bf16.mxu0 %v4050_v34  ;;  %v761_v34 = vld [vmem:[#allocation10 + $0x508] sm:$0xff] }
 0x375   :  { %v3681_v42 = vcombine.low %v761_v34, %v765_v35 }
 0x376   :  { %2265 = vmatpush1.bf16.msra.mxu1 %v3537_v54  ;;  %v717_v54 = vld [vmem:[#allocation10 + $0x3a8] sm:$0xff] }
 0x377   :  { %2266 = vmatprep.subr.bf16.mxu1 %v3546_v55  ;;  %3307 = vmatpush1.bf16.msra.mxu0 %v4048_v33  ;;  %v3625_v55 = vcombine.low %v705_v47, %v709_v48  ;;  %v3634_v56 = vcombine.high %v713_v53, %v717_v54  ;;  %v3633_v61 = vcombine.low %v713_v53, %v717_v54  ;;  %v4077_v33 = vld [vmem:[#allocation13 + $0xb4] ss:$8 sps:$4 sm:$0xff]   ;;  %v781_v47 = vld [vmem:[#allocation10 + $0x5a8] sm:$0xff] }
 0x378   :  { %3308 = vmatprep.subr.bf16.mxu0 %v4053_v40  ;;  %v769_v40 = vld [vmem:[#allocation10 + $0x548] sm:$0xff] }
 0x379   :  { %v3689_v48 = vcombine.low %v769_v40, %v773_v41  ;;  %v4084_v53 = vld [vmem:[#allocation13 + $0xe0] ss:$8 sps:$4 sm:$0xff]  }
 0x37a   :  { %2267 = vmatpush1.bf16.msra.mxu1 %v3545_v58  ;;  %v4062_v58 = vld [vmem:[#allocation13 + $0x64] ss:$8 sps:$4 sm:$0xff]  }
 0x37b   :  { %2268 = vmatprep.subr.bf16.mxu1 %v3554_v59  ;;  %3309 = vmatpush1.bf16.msra.mxu0 %v4051_v5  ;;  %v721_v59 = vld [vmem:[#allocation10 + $0x3c8] sm:$0xff] }
 0x37c   :  { %3310 = vmatprep.subr.bf16.mxu0 %v4056_v46  ;;  %v4080_v5 = vld [vmem:[#allocation13 + $0xc4] ss:$8 sps:$4 sm:$0xff]  }
 0x37d   :  { %v777_v46 = vld [vmem:[#allocation10 + $0x588] sm:$0xff] }
 0x37e   :  { %2269 = vmatpush1.bf16.msra.mxu1 %v3553_v62  ;;  %v3642_v62 = vcombine.high %v721_v59, %v725_v60  ;;  %v3697_v54 = vcombine.low %v777_v46, %v781_v47 }
 0x37f   :  { %2270 = vmatprep.subr.bf16.mxu1 %v3562_v63  ;;  %3311 = vmatpush1.bf16.msra.mxu0 %v4054_v45  ;;  %v4063_v63 = vld [vmem:[#allocation13 + $0x70] ss:$8 sps:$4 sm:$0xff]   ;;  %v4083_v45 = vld [vmem:[#allocation13 + $0xd4] ss:$8 sps:$4 sm:$0xff]  }
 0x380   :  { %3312 = vmatprep.subr.bf16.mxu0 %v4059_v52  ;;  %v789_v52 = vld [vmem:[#allocation10 + $0x5e8] sm:$0xff] }
 0x382   :  { %2271 = vmatpush1.bf16.msra.mxu1 %v3561_v2  ;;  %v733_v2 = vld [vmem:[#allocation10 + $0x428] sm:$0xff] }
 0x383   :  { %2272 = vmatprep.subr.bf16.mxu1 %v3570_v8  ;;  %3313 = vmatpush1.bf16.msra.mxu0 %v4057_v51  ;;  %v3641_v8 = vcombine.low %v721_v59, %v725_v60  ;;  %v3650_v9 = vcombine.high %v729_v1, %v733_v2  ;;  %v3649_v16 = vcombine.low %v729_v1, %v733_v2  ;;  %v785_v51 = vld [vmem:[#allocation10 + $0x5c8] sm:$0xff]  ;;  %v4087_v59 = vld [vmem:[#allocation13 + $0xf0] ss:$8 sps:$4 sm:$0xff]  }
 0x384   :  { %3314 = vmatprep.subr.bf16.mxu0 %v4062_v58  ;;  %v797_v58 = vld [vmem:[#allocation10 + $0x628] sm:$0xff]  ;;  %v3705_v60 = vcombine.low %v785_v51, %v789_v52 }
 0x385   :  { %v809_v2 = vld [vmem:[#allocation10 + $0x688] sm:$0xff] }
 0x386   :  { %2273 = vmatpush1.bf16.msra.mxu1 %v3569_v11  ;;  %v4068_v11 = vld [vmem:[#allocation13 + $0x84] ss:$8 sps:$4 sm:$0xff]  }
 0x387   :  { %2274 = vmatprep.subr.bf16.mxu1 %v3578_v13  ;;  %3315 = vmatpush1.bf16.msra.mxu0 %v4060_v57  ;;  %v737_v13 = vld [vmem:[#allocation10 + $0x448] sm:$0xff] }
 0x388   :  { %3316 = vmatprep.subr.bf16.mxu0 %v4065_v0  ;;  %v3657_v22 = vcombine.low %v737_v13, %v741_v14  ;;  %v793_v57 = vld [vmem:[#allocation10 + $0x608] sm:$0xff] }
 0x389   :  { %v3713_v0 = vcombine.low %v793_v57, %v797_v58 }
 0x38a   :  { %2275 = vmatpush1.bf16.msra.mxu1 %v3577_v17  ;;  %v3658_v17 = vcombine.high %v737_v13, %v741_v14  ;;  %v821_v13 = vld [vmem:[#allocation10 + $0x6e8] sm:$0xff] }
 0x38b   :  { %2276 = vmatprep.subr.bf16.mxu1 %v3586_v18  ;;  %3317 = vmatpush1.bf16.msra.mxu0 %v4063_v63  ;;  %v4071_v18 = vld [vmem:[#allocation13 + $0x94] ss:$8 sps:$4 sm:$0xff]   ;;  %v805_v63 = vld [vmem:[#allocation10 + $0x668] sm:$0xff] }
 0x38c   :  { %3318 = vmatprep.subr.bf16.mxu0 %v4068_v11  ;;  %v817_v11 = vld [vmem:[#allocation10 + $0x6c8] sm:$0xff] }
 0x38e   :  { %2277 = vmatpush1.bf16.msra.mxu1 %v3585_v23  ;;  %v3666_v23 = vcombine.high %v745_v19, %v749_v20  ;;  %v3737_v19 = vcombine.low %v817_v11, %v821_v13 }
 0x38f   :  { %2278 = vmatprep.subr.bf16.mxu1 %v3594_v24  ;;  %3319 = vmatpush1.bf16.msra.mxu0 %v4066_v10  ;;  %v4072_v24 = vld [vmem:[#allocation13 + $0xa0] ss:$8 sps:$4 sm:$0xff]  }
 0x390   :  { %3320 = vmatprep.subr.bf16.mxu0 %v4071_v18  ;;  %v829_v18 = vld [vmem:[#allocation10 + $0x728] sm:$0xff] }
 0x392   :  { %2279 = vmatpush1.bf16.msra.mxu1 %v3593_v31  ;;  %v3674_v31 = vcombine.high %v753_v26, %v757_v27  ;;  %v845_v26 = vld [vmem:[#allocation10 + $0x7a8] sm:$0xff] }
 0x393   :  { %2280 = vmatprep.subr.bf16.mxu1 %v3602_v32  ;;  %3321 = vmatpush1.bf16.msra.mxu0 %v4069_v21  ;;  %v4075_v32 = vld [vmem:[#allocation13 + $0xb0] ss:$8 sps:$4 sm:$0xff]   ;;  %v833_v21 = vld [vmem:[#allocation10 + $0x748] sm:$0xff] }
 0x394   :  { %3322 = vmatprep.subr.bf16.mxu0 %v4074_v25  ;;  %v841_v25 = vld [vmem:[#allocation10 + $0x788] sm:$0xff] }
 0x396   :  { %2281 = vmatpush1.bf16.msra.mxu1 %v3601_v38  ;;  %v3682_v38 = vcombine.high %v761_v34, %v765_v35  ;;  %v603_v35 = vld [vmem:[#allocation10 + $0x18] sm:$0xff] }
 0x397   :  { %2282 = vmatprep.subr.bf16.mxu1 %v3610_v39  ;;  %3323 = vmatpush1.bf16.msra.mxu0 %v4072_v24  ;;  %v4078_v39 = vld [vmem:[#allocation13 + $0xc0] ss:$8 sps:$4 sm:$0xff]  }
 0x398   :  { %3324 = vmatprep.subr.bf16.mxu0 %v4077_v33  ;;  %v3761_v33 = vcombine.low %v841_v25, %v845_v26 }
 0x39a   :  { %2283 = vmatpush1.bf16.msra.mxu1 %v3609_v43  ;;  %v3690_v43 = vcombine.high %v769_v40, %v773_v41  ;;  %v615_v40 = vld [vmem:[#allocation10 + $0x78] sm:$0xff] }
 0x39b   :  { %2284 = vmatprep.subr.bf16.mxu1 %v3618_v44  ;;  %3325 = vmatpush1.bf16.msra.mxu0 %v4075_v32  ;;  %v4081_v44 = vld [vmem:[#allocation13 + $0xd0] ss:$8 sps:$4 sm:$0xff]   ;;  %v853_v32 = vld [vmem:[#allocation10 + $0x7e8] sm:$0xff] }
 0x39c   :  { %3326 = vmatprep.subr.bf16.mxu0 %v4080_v5  ;;  %v611_v5 = vld [vmem:[#allocation10 + $0x58] sm:$0xff] }
 0x39e   :  { %2285 = vmatpush1.bf16.msra.mxu1 %v3617_v49  ;;  %v3698_v49 = vcombine.high %v777_v46, %v781_v47  ;;  %v3533_v46 = vcombine.low %v611_v5, %v615_v40 }
 0x39f   :  { %2286 = vmatprep.subr.bf16.mxu1 %v3626_v50  ;;  %3327 = vmatpush1.bf16.msra.mxu0 %v4078_v39  ;;  %v4086_v50 = vld [vmem:[#allocation13 + $0xe4] ss:$8 sps:$4 sm:$0xff]  }
 0x3a0   :  { %3328 = vmatprep.subr.bf16.mxu0 %v4083_v45  ;;  %v4092_v45 = vld [vmem:[#allocation13 + $0x104] ss:$8 sps:$4 sm:$0xff]  }
 0x3a2   :  { %2287 = vmatpush1.bf16.msra.mxu1 %v3625_v55  ;;  %v3706_v55 = vcombine.high %v785_v51, %v789_v52  ;;  %v635_v52 = vld [vmem:[#allocation10 + $0x118] sm:$0xff] }
 0x3a3   :  { %2288 = vmatprep.subr.bf16.mxu1 %v3634_v56  ;;  %3329 = vmatpush1.bf16.msra.mxu0 %v4081_v44  ;;  %v4089_v56 = vld [vmem:[#allocation13 + $0xf4] ss:$8 sps:$4 sm:$0xff]  }
 0x3a4   :  { %3330 = vmatprep.subr.bf16.mxu0 %v4086_v50  ;;  %v623_v44 = vld [vmem:[#allocation10 + $0xb8] sm:$0xff] }
 0x3a6   :  { %2289 = vmatpush1.bf16.msra.mxu1 %v3633_v61  ;;  %v3714_v61 = vcombine.high %v793_v57, %v797_v58  ;;  %v647_v57 = vld [vmem:[#allocation10 + $0x178] sm:$0xff] }
 0x3a7   :  { %2290 = vmatprep.subr.bf16.mxu1 %v3642_v62  ;;  %3331 = vmatpush1.bf16.msra.mxu0 %v4084_v53  ;;  %v801_v62 = vld [vmem:[#allocation10 + $0x648] sm:$0xff]  ;;  %v639_v53 = vld [vmem:[#allocation10 + $0x138] sm:$0xff] }
 0x3a8   :  { %3332 = vmatprep.subr.bf16.mxu0 %v4089_v56  ;;  %v3722_v1 = vcombine.high %v801_v62, %v805_v63  ;;  %v643_v56 = vld [vmem:[#allocation10 + $0x158] sm:$0xff] }
 0x3a9   :  { %v3566_v58 = vcombine.high %v643_v56, %v647_v57 }
 0x3aa   :  { %2291 = vmatpush1.bf16.msra.mxu1 %v3641_v8  ;;  %v813_v8 = vld [vmem:[#allocation10 + $0x6a8] sm:$0xff] }
 0x3ab   :  { %2301 = vmatprep.subr.bf16.mxu1 %v3650_v9  ;;  %3333 = vmatpush1.bf16.msra.mxu0 %v4087_v59  ;;  %v3721_v9 = vcombine.low %v801_v62, %v805_v63  ;;  %v3730_v10 = vcombine.high %v809_v2, %v813_v8  ;;  %v3729_v14 = vcombine.low %v809_v2, %v813_v8  ;;  %v651_v59 = vld [vmem:[#allocation10 + $0x198] sm:$0xff] }
 0x3ac   :  { %3343 = vmatprep.subr.bf16.mxu0 %v4092_v45  ;;  %v659_v63 = vld [vmem:[#allocation10 + $0x1d8] sm:$0xff] }
 0x3ad   :  { %2293 = vmatmul.mubr.bf16.vlgmr.msra.gmra.mrb[12].mxu1 %v4633_v30  ;;  %v667_v8 = vld [vmem:[#allocation10 + $0x218] sm:$0xff] }
 0x3ae   :  { %2302 = vmatpush1.bf16.msra.mxu1 %v3649_v16  ;;  %2333 = vmatprep.mubr.bf16.mxu1 %v4637_v37  ;;  %v3738_v16 = vcombine.high %v817_v11, %v821_v13  ;;  %v675_v13 = vld [vmem:[#allocation10 + $0x258] sm:$0xff] }
 0x3af   :  { %2303 = vmatprep.subr.bf16.mxu1 %v3658_v17  ;;  %v825_v17 = vld [vmem:[#allocation10 + $0x708] sm:$0xff]  ;;  %v735_v45 = vld [vmem:[#allocation10 + $0x438] sm:$0xff] }
 0x3b0   :  { %v3746_v20 = vcombine.high %v825_v17, %v829_v18 }
 0x3b2   :  { %2304 = vmatpush1.bf16.msra.mxu1 %v3657_v22  ;;  %v837_v22 = vld [vmem:[#allocation10 + $0x768] sm:$0xff] }
 0x3b3   :  { %2305 = vmatprep.subr.bf16.mxu1 %v3666_v23  ;;  %v3745_v23 = vcombine.low %v825_v17, %v829_v18  ;;  %v3754_v24 = vcombine.high %v833_v21, %v837_v22  ;;  %v3753_v27 = vcombine.low %v833_v21, %v837_v22  ;;  %v683_v18 = vld [vmem:[#allocation10 + $0x298] sm:$0xff] }
 0x3b4   :  { %v691_v22 = vld [vmem:[#allocation10 + $0x2d8] sm:$0xff] }
 0x3b6   :  { %2306 = vmatpush1.bf16.msra.mxu1 %v3665_v28  ;;  %v3762_v28 = vcombine.high %v841_v25, %v845_v26  ;;  %v699_v26 = vld [vmem:[#allocation10 + $0x318] sm:$0xff] }
 0x3b7   :  { %2307 = vmatprep.subr.bf16.mxu1 %v3674_v31  ;;  %v849_v31 = vld [vmem:[#allocation10 + $0x7c8] sm:$0xff] }
 0x3b8   :  { %v3770_v34 = vcombine.high %v849_v31, %v853_v32 }
 0x3ba   :  { %2308 = vmatpush1.bf16.msra.mxu1 %v3673_v36  ;;  %v607_v36 = vld [vmem:[#allocation10 + $0x38] sm:$0xff] }
 0x3bb   :  { %2309 = vmatprep.subr.bf16.mxu1 %v3682_v38  ;;  %v3769_v38 = vcombine.low %v849_v31, %v853_v32  ;;  %v3526_v39 = vcombine.high %v603_v35, %v607_v36  ;;  %v3525_v41 = vcombine.low %v603_v35, %v607_v36  ;;  %v707_v32 = vld [vmem:[#allocation10 + $0x358] sm:$0xff] }
 0x3bc   :  { %v715_v36 = vld [vmem:[#allocation10 + $0x398] sm:$0xff] }
 0x3be   :  { %2310 = vmatpush1.bf16.msra.mxu1 %v3681_v42  ;;  %v3534_v42 = vcombine.high %v611_v5, %v615_v40  ;;  %v723_v40 = vld [vmem:[#allocation10 + $0x3d8] sm:$0xff] }
 0x3bf   :  { %2311 = vmatprep.subr.bf16.mxu1 %v3690_v43  ;;  %v619_v43 = vld [vmem:[#allocation10 + $0x98] sm:$0xff] }
 0x3c0   :  { %v3542_v47 = vcombine.high %v619_v43, %v623_v44  ;;  %v3541_v50 = vcombine.low %v619_v43, %v623_v44  ;;  %v731_v44 = vld [vmem:[#allocation10 + $0x418] sm:$0xff] }
 0x3c2   :  { %2312 = vmatpush1.bf16.msra.mxu1 %v3689_v48  ;;  %v627_v48 = vld [vmem:[#allocation10 + $0xd8] sm:$0xff] }
 0x3c3   :  { %2313 = vmatprep.subr.bf16.mxu1 %v3698_v49  ;;  %v631_v49 = vld [vmem:[#allocation10 + $0xf8] sm:$0xff] }
 0x3c4   :  { %v3550_v51 = vcombine.high %v627_v48, %v631_v49 }
 0x3c6   :  { %2314 = vmatpush1.bf16.msra.mxu1 %v3697_v54  ;;  %v3549_v54 = vcombine.low %v627_v48, %v631_v49  ;;  %v739_v48 = vld [vmem:[#allocation10 + $0x458] sm:$0xff] }
 0x3c7   :  { %2315 = vmatprep.subr.bf16.mxu1 %v3706_v55  ;;  %v3558_v55 = vcombine.high %v635_v52, %v639_v53  ;;  %v743_v49 = vld [vmem:[#allocation10 + $0x478] sm:$0xff] }
 0x3ca   :  { %2316 = vmatpush1.bf16.msra.mxu1 %v3705_v60  ;;  %v655_v60 = vld [vmem:[#allocation10 + $0x1b8] sm:$0xff] }
 0x3cb   :  { %2317 = vmatprep.subr.bf16.mxu1 %v3714_v61  ;;  %v3565_v61 = vcombine.low %v643_v56, %v647_v57  ;;  %v3574_v62 = vcombine.high %v651_v59, %v655_v60  ;;  %v755_v56 = vld [vmem:[#allocation10 + $0x4d8] sm:$0xff] }
 0x3cc   :  { %v759_v57 = vld [vmem:[#allocation10 + $0x4f8] sm:$0xff] }
 0x3ce   :  { %2318 = vmatpush1.bf16.msra.mxu1 %v3713_v0  ;;  %v663_v0 = vld [vmem:[#allocation10 + $0x1f8] sm:$0xff] }
 0x3cf   :  { %2319 = vmatprep.subr.bf16.mxu1 %v3722_v1  ;;  %v3573_v1 = vcombine.low %v651_v59, %v655_v60  ;;  %v3582_v2 = vcombine.high %v659_v63, %v663_v0  ;;  %v763_v59 = vld [vmem:[#allocation10 + $0x518] sm:$0xff] }
 0x3d0   :  { %v767_v60 = vld [vmem:[#allocation10 + $0x538] sm:$0xff] }
 0x3d2   :  { %2320 = vmatpush1.bf16.msra.mxu1 %v3721_v9  ;;  %v671_v9 = vld [vmem:[#allocation10 + $0x238] sm:$0xff] }
 0x3d3   :  { %2321 = vmatprep.subr.bf16.mxu1 %v3730_v10  ;;  %v3581_v10 = vcombine.low %v659_v63, %v663_v0  ;;  %v3590_v11 = vcombine.high %v667_v8, %v671_v9  ;;  %v771_v63 = vld [vmem:[#allocation10 + $0x558] sm:$0xff]  ;;  %v3685_v0 = vcombine.low %v763_v59, %v767_v60 }
 0x3d6   :  { %2322 = vmatpush1.bf16.msra.mxu1 %v3729_v14  ;;  %v679_v14 = vld [vmem:[#allocation10 + $0x278] sm:$0xff] }
 0x3d7   :  { %2323 = vmatprep.subr.bf16.mxu1 %v3738_v16  ;;  %v3589_v16 = vcombine.low %v667_v8, %v671_v9  ;;  %v3598_v17 = vcombine.high %v675_v13, %v679_v14  ;;  %v783_v8 = vld [vmem:[#allocation10 + $0x5b8] sm:$0xff] }
 0x3da   :  { %2324 = vmatpush1.bf16.msra.mxu1 %v3737_v19  ;;  %v687_v19 = vld [vmem:[#allocation10 + $0x2b8] sm:$0xff] }
 0x3db   :  { %2325 = vmatprep.subr.bf16.mxu1 %v3746_v20  ;;  %v3597_v20 = vcombine.low %v675_v13, %v679_v14  ;;  %v3606_v21 = vcombine.high %v683_v18, %v687_v19 }
 0x3de   :  { %2326 = vmatpush1.bf16.msra.mxu1 %v3745_v23  ;;  %v695_v23 = vld [vmem:[#allocation10 + $0x2f8] sm:$0xff] }
 0x3df   :  { %2327 = vmatprep.subr.bf16.mxu1 %v3754_v24  ;;  %v3605_v24 = vcombine.low %v683_v18, %v687_v19  ;;  %v3614_v25 = vcombine.high %v691_v22, %v695_v23  ;;  %v791_v18 = vld [vmem:[#allocation10 + $0x5f8] sm:$0xff] }
 0x3e2   :  { %2328 = vmatpush1.bf16.msra.mxu1 %v3753_v27  ;;  %v703_v27 = vld [vmem:[#allocation10 + $0x338] sm:$0xff] }
 0x3e3   :  { %2329 = vmatprep.subr.bf16.mxu1 %v3762_v28  ;;  %v3613_v28 = vcombine.low %v691_v22, %v695_v23  ;;  %v3622_v31 = vcombine.high %v699_v26, %v703_v27 }
 0x3e6   :  { %2330 = vmatpush1.bf16.msra.mxu1 %v3761_v33  ;;  %v711_v33 = vld [vmem:[#allocation10 + $0x378] sm:$0xff] }
 0x3e7   :  { %2331 = vmatprep.subr.bf16.mxu1 %v3770_v34  ;;  %v3621_v34 = vcombine.low %v699_v26, %v703_v27  ;;  %v3630_v35 = vcombine.high %v707_v32, %v711_v33 }
 0x3ea   :  { %2332 = vmatpush1.bf16.msra.mxu1 %v3769_v38  ;;  %v719_v38 = vld [vmem:[#allocation10 + $0x3b8] sm:$0xff] }
 0x3eb   :  { %2424 = vmatprep.subr.bf16.mxu1 %v3526_v39  ;;  %v3629_v39 = vcombine.low %v707_v32, %v711_v33  ;;  %v3638_v5 = vcombine.high %v715_v36, %v719_v38  ;;  %v795_v33 = vld [vmem:[#allocation10 + $0x618] sm:$0xff] }
 0x3ed   :  { %2334 = vmatmul.mubr.bf16.vlgmr.msra.gmra.mrb[12].mxu1 %v4648_v12 }
 0x3ee   :  { %2425 = vmatpush1.bf16.msra.mxu1 %v3525_v41  ;;  %2456 = vmatprep.mubr.bf16.mxu1 %v4631_v29  ;;  %v3557_v29 = vcombine.low %v635_v52, %v639_v53  ;;  %v727_v41 = vld [vmem:[#allocation10 + $0x3f8] sm:$0xff] }
 0x3ef   :  { %2426 = vmatprep.subr.bf16.mxu1 %v3534_v42  ;;  %v3637_v42 = vcombine.low %v715_v36, %v719_v38  ;;  %v3646_v43 = vcombine.high %v723_v40, %v727_v41  ;;  %v747_v52 = vld [vmem:[#allocation10 + $0x498] sm:$0xff]  ;;  %v4090_v38 = vld [vmem:[#allocation13 + $0x100] ss:$8 sps:$4 sm:$0xff]  }
 0x3f0   :  { %v751_v53 = vld [vmem:[#allocation10 + $0x4b8] sm:$0xff] }
 0x3f2   :  { %2427 = vmatpush1.bf16.msra.mxu1 %v3533_v46  ;;  %v3645_v46 = vcombine.low %v723_v40, %v727_v41  ;;  %v4095_v40 = vld [vmem:[#allocation13 + $0x114] ss:$8 sps:$4 sm:$0xff]  }
 0x3f3   :  { %2428 = vmatprep.subr.bf16.mxu1 %v3542_v47  ;;  %v3654_v47 = vcombine.high %v731_v44, %v735_v45  ;;  %v803_v41 = vld [vmem:[#allocation10 + $0x658] sm:$0xff] }
 0x3f6   :  { %2429 = vmatpush1.bf16.msra.mxu1 %v3541_v50  ;;  %v3653_v50 = vcombine.low %v731_v44, %v735_v45  ;;  %v4093_v44 = vld [vmem:[#allocation13 + $0x110] ss:$8 sps:$4 sm:$0xff]  }
 0x3f7   :  { %2430 = vmatprep.subr.bf16.mxu1 %v3550_v51  ;;  %v3662_v51 = vcombine.high %v739_v48, %v743_v49 }
 0x3fa   :  { %2431 = vmatpush1.bf16.msra.mxu1 %v3549_v54  ;;  %v3661_v54 = vcombine.low %v739_v48, %v743_v49  ;;  %v815_v48 = vld [vmem:[#allocation10 + $0x6b8] sm:$0xff] }
 0x3fb   :  { %2432 = vmatprep.subr.bf16.mxu1 %v3558_v55  ;;  %v3670_v55 = vcombine.high %v747_v52, %v751_v53 }
 0x3fe   :  { %2433 = vmatpush1.bf16.msra.mxu1 %v3557_v29  ;;  %v3669_v29 = vcombine.low %v747_v52, %v751_v53  ;;  %v4101_v52 = vld [vmem:[#allocation13 + $0x134] ss:$8 sps:$4 sm:$0xff]  }
 0x3ff   :  { %2434 = vmatprep.subr.bf16.mxu1 %v3566_v58  ;;  %v3678_v58 = vcombine.high %v755_v56, %v759_v57  ;;  %v819_v53 = vld [vmem:[#allocation10 + $0x6d8] sm:$0xff] }
 0x402   :  { %2435 = vmatpush1.bf16.msra.mxu1 %v3565_v61  ;;  %v3677_v61 = vcombine.low %v755_v56, %v759_v57  ;;  %v4099_v56 = vld [vmem:[#allocation13 + $0x130] ss:$8 sps:$4 sm:$0xff]  }
 0x403   :  { %2436 = vmatprep.subr.bf16.mxu1 %v3574_v62  ;;  %v3686_v62 = vcombine.high %v763_v59, %v767_v60  ;;  %v831_v59 = vld [vmem:[#allocation10 + $0x738] sm:$0xff] }
 0x406   :  { %2437 = vmatpush1.bf16.msra.mxu1 %v3573_v1 }
 0x407   :  { %2438 = vmatprep.subr.bf16.mxu1 %v3582_v2  ;;  %v779_v2 = vld [vmem:[#allocation10 + $0x598] sm:$0xff] }
 0x408   :  { %v3702_v13 = vcombine.high %v779_v2, %v783_v8 }
 0x40a   :  { %2439 = vmatpush1.bf16.msra.mxu1 %v3581_v10 }
 0x40b   :  { %2440 = vmatprep.subr.bf16.mxu1 %v3590_v11 }
 0x40e   :  { %2441 = vmatpush1.bf16.msra.mxu1 %v3589_v16 }
 0x40f   :  { %2442 = vmatprep.subr.bf16.mxu1 %v3598_v17  ;;  %v787_v17 = vld [vmem:[#allocation10 + $0x5d8] sm:$0xff] }
 0x410   :  { %v3709_v36 = vcombine.low %v787_v17, %v791_v18 }
 0x412   :  { %2443 = vmatpush1.bf16.msra.mxu1 %v3597_v20 }
 0x413   :  { %2444 = vmatprep.subr.bf16.mxu1 %v3606_v21 }
 0x416   :  { %2445 = vmatpush1.bf16.msra.mxu1 %v3605_v24 }
 0x417   :  { %2446 = vmatprep.subr.bf16.mxu1 %v3614_v25  ;;  %v3701_v25 = vcombine.low %v779_v2, %v783_v8  ;;  %v4105_v2 = vld [vmem:[#allocation13 + $0x150] ss:$8 sps:$4 sm:$0xff]  }
 0x41a   :  { %2447 = vmatpush1.bf16.msra.mxu1 %v3613_v28 }
 0x41b   :  { %2448 = vmatprep.subr.bf16.mxu1 %v3622_v31  ;;  %v3710_v31 = vcombine.high %v787_v17, %v791_v18  ;;  %v4113_v18 = vld [vmem:[#allocation13 + $0x174] ss:$8 sps:$4 sm:$0xff]  }
 0x41e   :  { %2449 = vmatpush1.bf16.msra.mxu1 %v3621_v34  ;;  %v799_v34 = vld [vmem:[#allocation10 + $0x638] sm:$0xff] }
 0x41f   :  { %2450 = vmatprep.subr.bf16.mxu1 %v3630_v35 }
 0x422   :  { %2451 = vmatpush1.bf16.msra.mxu1 %v3629_v39 }
 0x423   :  { %2452 = vmatprep.subr.bf16.mxu1 %v3638_v5  ;;  %v3718_v5 = vcombine.high %v795_v33, %v799_v34 }
 0x426   :  { %2453 = vmatpush1.bf16.msra.mxu1 %v3637_v42  ;;  %v807_v42 = vld [vmem:[#allocation10 + $0x678] sm:$0xff] }
 0x427   :  { %2454 = vmatprep.subr.bf16.mxu1 %v3646_v43  ;;  %v3717_v43 = vcombine.low %v795_v33, %v799_v34  ;;  %v3726_v45 = vcombine.high %v803_v41, %v807_v42  ;;  %v3725_v49 = vcombine.low %v803_v41, %v807_v42  ;;  %v4120_v33 = vld [vmem:[#allocation13 + $0x1a0] ss:$8 sps:$4 sm:$0xff]   ;;  %v4125_v34 = vld [vmem:[#allocation13 + $0x1b4] ss:$8 sps:$4 sm:$0xff]   ;;  %v4135_v42 = vld [vmem:[#allocation13 + $0x1f0] ss:$8 sps:$4 sm:$0xff]  }
 0x428   :  { %v4132_v41 = vld [vmem:[#allocation13 + $0x1e0] ss:$8 sps:$4 sm:$0xff]  }
 0x42a   :  { %2455 = vmatpush1.bf16.msra.mxu1 %v3645_v46  ;;  %v4098_v46 = vld [vmem:[#allocation13 + $0x124] ss:$8 sps:$4 sm:$0xff]  }
 0x42b   :  { %2465 = vmatprep.subr.bf16.mxu1 %v3654_v47  ;;  %v811_v47 = vld [vmem:[#allocation10 + $0x698] sm:$0xff] }
 0x42d   :  { %2457 = vmatmul.mubr.bf16.vlgmr.msra.gmra.mrb[16].mxu1 %v4633_v30  ;;  %v775_v30 = vld [vmem:[#allocation10 + $0x578] sm:$0xff] }
 0x42e   :  { %2466 = vmatpush1.bf16.msra.mxu1 %v3653_v50  ;;  %2497 = vmatprep.mubr.bf16.mxu1 %v4637_v37  ;;  %v4659_v37 = vld [vmem:[#allocation12] sm:$0xff]  ;;  %v3694_v1 = vcombine.high %v771_v63, %v775_v30  ;;  %v3693_v11 = vcombine.low %v771_v63, %v775_v30  ;;  %v4096_v50 = vld [vmem:[#allocation13 + $0x120] ss:$8 sps:$4 sm:$0xff]   ;;  %v835_v30 = vld [vmem:[#allocation10 + $0x758] sm:$0xff] }
 0x42f   :  { %2467 = vmatprep.subr.bf16.mxu1 %v3662_v51  ;;  %v861_v9 = vrot.slane %v4659_v37, %v4611_v4  ;;  %v865_v10 = vrot.slane %v4659_v37, %v4619_v6  ;;  %v3734_v51 = vcombine.high %v811_v47, %v815_v48  ;;  %v4107_v63 = vld [vmem:[#allocation13 + $0x154] ss:$8 sps:$4 sm:$0xff]  }
 0x432   :  { %2468 = vmatpush1.bf16.msra.mxu1 %v3661_v54  ;;  %v823_v54 = vld [vmem:[#allocation10 + $0x6f8] sm:$0xff] }
 0x433   :  { %2469 = vmatprep.subr.bf16.mxu1 %v3670_v55  ;;  %v3733_v55 = vcombine.low %v811_v47, %v815_v48  ;;  %v3742_v57 = vcombine.high %v819_v53, %v823_v54  ;;  %v3741_v60 = vcombine.low %v819_v53, %v823_v54  ;;  %v873_v47 = vrot.slane %v4659_v37, %v344_v7  ;;  %v4141_v7 = vld [vmem:[#allocation13 + $0x210] ss:$8 sps:$4 sm:$0xff]  }
 0x436   :  { %2470 = vmatpush1.bf16.msra.mxu1 %v3669_v29  ;;  %v4104_v29 = vld [vmem:[#allocation13 + $0x144] ss:$8 sps:$4 sm:$0xff]  }
 0x437   :  { %2471 = vmatprep.subr.bf16.mxu1 %v3678_v58  ;;  %v827_v58 = vld [vmem:[#allocation10 + $0x718] sm:$0xff] }
 0x43a   :  { %2472 = vmatpush1.bf16.msra.mxu1 %v3677_v61  ;;  %v4102_v61 = vld [vmem:[#allocation13 + $0x140] ss:$8 sps:$4 sm:$0xff]  }
 0x43b   :  { %2473 = vmatprep.subr.bf16.mxu1 %v3686_v62  ;;  %v3750_v62 = vcombine.high %v827_v58, %v831_v59 }
 0x43e   :  { %2474 = vmatpush1.bf16.msra.mxu1 %v3685_v0  ;;  %v839_v0 = vld [vmem:[#allocation10 + $0x778] sm:$0xff] }
 0x43f   :  { %2475 = vmatprep.subr.bf16.mxu1 %v3694_v1  ;;  %v3749_v1 = vcombine.low %v827_v58, %v831_v59  ;;  %v3758_v8 = vcombine.high %v835_v30, %v839_v0  ;;  %v4138_v58 = vld [vmem:[#allocation13 + $0x200] ss:$8 sps:$4 sm:$0xff]  }
 0x440   :  { %v2253_v14 = vpop.f32.mrb[8].mxu1  ;;  %v4665_v16 = vpop.f32.mrb[8].mxu0 }
 0x441   :  { %v3931_v19 = vadd.f32 %v2253_v14, %v861_v9  ;;  %v2255_v20 = vpop.f32.mrb[9].mxu1  ;;  %v4667_v21 = vpop.f32.mrb[9].mxu0  ;;  %v4110_v9 = vld [vmem:[#allocation13 + $0x164] ss:$8 sps:$4 sm:$0xff]   ;;  %v4108_v14 = vld [vmem:[#allocation13 + $0x160] ss:$8 sps:$4 sm:$0xff]  }
 0x442   :  { %v3932_v22 = vadd.f32 %v2255_v20, %v865_v10  ;;  %v2257_v23 = vpop.f32.mrb[10].mxu1  ;;  %v2421_v24 = vpop.f32.mrb[10].mxu0  ;;  %2476 = vmatpush1.bf16.msra.mxu1 %v3693_v11  ;;  %v843_v10 = vld [vmem:[#allocation10 + $0x798] sm:$0xff] }
 0x443   :  { %v2506_v26 = vmax.f32 %v3931_v19, 0.0  ;;  %v2258_v27 = vpop.f32.mrb[11].mxu1  ;;  %v2422_v28 = vpop.f32.mrb[11].mxu0  ;;  %2477 = vmatprep.subr.bf16.mxu1 %v3702_v13  ;;  %v847_v11 = vld [vmem:[#allocation10 + $0x7b8] sm:$0xff]  ;;  %v3757_v13 = vcombine.low %v835_v30, %v839_v0  ;;  %v4152_v30 = vld [vmem:[#allocation13 + $0x244] ss:$8 sps:$4 sm:$0xff]  }
 0x444   :  { %v2507_v32 = vmax.f32 %v3932_v22, 0.0  ;;  %v3766_v17 = vcombine.high %v843_v10, %v847_v11  ;;  %v851_v19 = vld [vmem:[#allocation10 + $0x7d8] sm:$0xff]  ;;  %v3765_v22 = vcombine.low %v843_v10, %v847_v11  ;;  %v4114_v27 = vld [vmem:[#allocation13 + $0x180] ss:$8 sps:$4 sm:$0xff]  }
 0x445   :  { %v2514_v39 = vpack.c.bf16 %v2506_v26, %v2506_v26  ;;  %v855_v20 = vld [vmem:[#allocation10 + $0x7f8] sm:$0xff]  ;;  %v4150_v0 = vld [vmem:[#allocation13 + $0x240] ss:$8 sps:$4 sm:$0xff]  }
 0x446   :  { %v2515_v35 = vpack.c.bf16 %v2507_v32, %v2507_v32  ;;  %2478 = vmatpush1.bf16.msra.mxu1 %v3701_v25  ;;  %v4111_v23 = vld [vmem:[#allocation13 + $0x170] ss:$8 sps:$4 sm:$0xff]   ;;  %v3774_v24 = vcombine.high %v851_v19, %v855_v20  ;;  %v4116_v25 = vld [vmem:[#allocation13 + $0x184] ss:$8 sps:$4 sm:$0xff]   ;;  %v3773_v26 = vcombine.low %v851_v19, %v855_v20  ;;  %v4119_v28 = vld [vmem:[#allocation13 + $0x194] ss:$8 sps:$4 sm:$0xff]  }
 0x447   :  { %2479 = vmatprep.subr.bf16.mxu1 %v3710_v31  ;;  %v4117_v31 = vld [vmem:[#allocation13 + $0x190] ss:$8 sps:$4 sm:$0xff]   ;;  %v4122_v32 = vld [vmem:[#allocation13 + $0x1a4] ss:$8 sps:$4 sm:$0xff]   ;;  %v4161_v10 = vld [vmem:[#allocation13 + $0x274] ss:$8 sps:$4 sm:$0xff]  }
 0x448   :  { %3334 = vmatprep.mubr.bf16.mxu0 %v2515_v35  ;;  %v4123_v35 = vld [vmem:[#allocation13 + $0x1b0] ss:$8 sps:$4 sm:$0xff]   ;;  %v4170_v19 = vld [vmem:[#allocation13 + $0x2a4] ss:$8 sps:$4 sm:$0xff]   ;;  %v4168_v20 = vld [vmem:[#allocation13 + $0x2a0] ss:$8 sps:$4 sm:$0xff]  }
 0x449   :  { %3335 = vmatmul.mubr.bf16.vlgmr.msra.gmra.mrb[12].mxu0 %v2514_v39  ;;  %v4131_v39 = vld [vmem:[#allocation13 + $0x1d4] ss:$8 sps:$4 sm:$0xff]   ;;  %v4159_v11 = vld [vmem:[#allocation13 + $0x270] ss:$8 sps:$4 sm:$0xff]  }
 0x44a   :  { %2480 = vmatpush1.bf16.msra.mxu1 %v3709_v36  ;;  %3344 = vmatpush1.bf16.msra.mxu0 %v4090_v38  ;;  %v4128_v36 = vld [vmem:[#allocation13 + $0x1c4] ss:$8 sps:$4 sm:$0xff]   ;;  %v4126_v38 = vld [vmem:[#allocation13 + $0x1c0] ss:$8 sps:$4 sm:$0xff]  }
 0x44b   :  { %2481 = vmatprep.subr.bf16.mxu1 %v3718_v5  ;;  %3345 = vmatprep.subr.bf16.mxu0 %v4095_v40  ;;  %v4129_v5 = vld [vmem:[#allocation13 + $0x1d0] ss:$8 sps:$4 sm:$0xff]   ;;  %v4134_v40 = vld [vmem:[#allocation13 + $0x1e4] ss:$8 sps:$4 sm:$0xff]  }
 0x44e   :  { %2482 = vmatpush1.bf16.msra.mxu1 %v3717_v43  ;;  %3346 = vmatpush1.bf16.msra.mxu0 %v4093_v44  ;;  %v4140_v43 = vld [vmem:[#allocation13 + $0x204] ss:$8 sps:$4 sm:$0xff]   ;;  %v880_v44 = vsub.s32 5, %v4608_v3 }
 0x44f   :  { %2483 = vmatprep.subr.bf16.mxu1 %v3726_v45  ;;  %3347 = vmatprep.subr.bf16.mxu0 %v4098_v46  ;;  %v869_v46 = vrot.slane %v4659_v37, %v340_v15 }
 0x450   :  { %v881_v45 = vrot.slane %v4659_v37, %v880_v44  ;;  %v4195_v44 = vld [vmem:[#allocation13 + $0x330] ss:$8 sps:$4 sm:$0xff]  }
 0x452   :  { %2484 = vmatpush1.bf16.msra.mxu1 %v3725_v49  ;;  %3348 = vmatpush1.bf16.msra.mxu0 %v4096_v50  ;;  %v3936_v48 = vadd.f32 %v4667_v21, %v881_v45  ;;  %v4146_v21 = vld [vmem:[#allocation13 + $0x224] ss:$8 sps:$4 sm:$0xff]  }
 0x453   :  { %2485 = vmatprep.subr.bf16.mxu1 %v3734_v51  ;;  %3349 = vmatprep.subr.bf16.mxu0 %v4101_v52  ;;  %v4200_v45 = vld [vmem:[#allocation13 + $0x344] ss:$8 sps:$4 sm:$0xff]  }
 0x456   :  { %2486 = vmatpush1.bf16.msra.mxu1 %v3733_v55  ;;  %3350 = vmatpush1.bf16.msra.mxu0 %v4099_v56  ;;  %v2511_v56 = vmax.f32 %v3936_v48, 0.0  ;;  %v4201_v48 = vld [vmem:[#allocation13 + $0x350] ss:$8 sps:$4 sm:$0xff]  }
 0x457   :  { %2487 = vmatprep.subr.bf16.mxu1 %v3742_v57  ;;  %3351 = vmatprep.subr.bf16.mxu0 %v4104_v29 }
 0x458   :  { %v2519_v15 = vpack.c.bf16 %v2511_v56, %v2511_v56  ;;  %v4213_v56 = vld [vmem:[#allocation13 + $0x390] ss:$8 sps:$4 sm:$0xff]  }
 0x45a   :  { %2488 = vmatpush1.bf16.msra.mxu1 %v3741_v60  ;;  %3352 = vmatpush1.bf16.msra.mxu0 %v4102_v61  ;;  %v4143_v60 = vld [vmem:[#allocation13 + $0x214] ss:$8 sps:$4 sm:$0xff]   ;;  %v4144_v61 = vld [vmem:[#allocation13 + $0x220] ss:$8 sps:$4 sm:$0xff]  }
 0x45b   :  { %2489 = vmatprep.subr.bf16.mxu1 %v3750_v62  ;;  %3353 = vmatprep.subr.bf16.mxu0 %v4107_v63  ;;  %v4149_v62 = vld [vmem:[#allocation13 + $0x234] ss:$8 sps:$4 sm:$0xff]   ;;  %v4147_v63 = vld [vmem:[#allocation13 + $0x230] ss:$8 sps:$4 sm:$0xff]  }
 0x45e   :  { %2490 = vmatpush1.bf16.msra.mxu1 %v3749_v1  ;;  %3354 = vmatpush1.bf16.msra.mxu0 %v4105_v2  ;;  %v4155_v1 = vld [vmem:[#allocation13 + $0x254] ss:$8 sps:$4 sm:$0xff]   ;;  %v4153_v2 = vld [vmem:[#allocation13 + $0x250] ss:$8 sps:$4 sm:$0xff]  }
 0x45f   :  { %2491 = vmatprep.subr.bf16.mxu1 %v3758_v8  ;;  %3355 = vmatprep.subr.bf16.mxu0 %v4110_v9  ;;  %v4158_v8 = vld [vmem:[#allocation13 + $0x264] ss:$8 sps:$4 sm:$0xff]   ;;  %v4156_v9 = vld [vmem:[#allocation13 + $0x260] ss:$8 sps:$4 sm:$0xff]  }
 0x462   :  { %2492 = vmatpush1.bf16.msra.mxu1 %v3757_v13  ;;  %3356 = vmatpush1.bf16.msra.mxu0 %v4108_v14  ;;  %v4164_v13 = vld [vmem:[#allocation13 + $0x284] ss:$8 sps:$4 sm:$0xff]   ;;  %v4162_v14 = vld [vmem:[#allocation13 + $0x280] ss:$8 sps:$4 sm:$0xff]  }
 0x463   :  { %2493 = vmatprep.subr.bf16.mxu1 %v3766_v17  ;;  %3357 = vmatprep.subr.bf16.mxu0 %v4113_v18  ;;  %v4167_v17 = vld [vmem:[#allocation13 + $0x294] ss:$8 sps:$4 sm:$0xff]   ;;  %v4165_v18 = vld [vmem:[#allocation13 + $0x290] ss:$8 sps:$4 sm:$0xff]  }
 0x466   :  { %2494 = vmatpush1.bf16.msra.mxu1 %v3765_v22  ;;  %3358 = vmatpush1.bf16.msra.mxu0 %v4111_v23  ;;  %v4173_v22 = vld [vmem:[#allocation13 + $0x2b4] ss:$8 sps:$4 sm:$0xff]   ;;  %v4171_v23 = vld [vmem:[#allocation13 + $0x2b0] ss:$8 sps:$4 sm:$0xff]  }
 0x467   :  { %2495 = vmatprep.subr.bf16.mxu1 %v3774_v24  ;;  %3359 = vmatprep.subr.bf16.mxu0 %v4116_v25  ;;  %v4176_v24 = vld [vmem:[#allocation13 + $0x2c4] ss:$8 sps:$4 sm:$0xff]   ;;  %v4174_v25 = vld [vmem:[#allocation13 + $0x2c0] ss:$8 sps:$4 sm:$0xff]  }
 0x46a   :  { %2496 = vmatpush1.bf16.msra.mxu1 %v3773_v26  ;;  %3360 = vmatpush1.bf16.msra.mxu0 %v4114_v27  ;;  %v876_v26 = vsub.s32 4, %v4608_v3  ;;  %v4179_v27 = vld [vmem:[#allocation13 + $0x2d4] ss:$8 sps:$4 sm:$0xff]  }
 0x46b   :  { %3361 = vmatprep.subr.bf16.mxu0 %v4119_v28  ;;  %v4177_v28 = vld [vmem:[#allocation13 + $0x2d0] ss:$8 sps:$4 sm:$0xff]  }
 0x46d   :  { %2498 = vmatmul.mubr.bf16.vlgmr.msra.gmra.mrb[16].mxu1 %v4648_v12  ;;  %v4137_v12 = vld [vmem:[#allocation13 + $0x1f4] ss:$8 sps:$4 sm:$0xff]  }
 0x46e   :  { %3362 = vmatpush1.bf16.msra.mxu0 %v4117_v31  ;;  %v877_v31 = vrot.slane %v4659_v37, %v876_v26 }
 0x46f   :  { %3363 = vmatprep.subr.bf16.mxu0 %v4122_v32  ;;  %v4182_v32 = vld [vmem:[#allocation13 + $0x2e4] ss:$8 sps:$4 sm:$0xff]  }
 0x472   :  { %3364 = vmatpush1.bf16.msra.mxu0 %v4120_v33  ;;  %v4180_v33 = vld [vmem:[#allocation13 + $0x2e0] ss:$8 sps:$4 sm:$0xff]  }
 0x473   :  { %3365 = vmatprep.subr.bf16.mxu0 %v4125_v34  ;;  %v3935_v34 = vadd.f32 %v4665_v16, %v877_v31  ;;  %v4197_v16 = vld [vmem:[#allocation13 + $0x334] ss:$8 sps:$4 sm:$0xff]  }
 0x476   :  { %3366 = vmatpush1.bf16.msra.mxu0 %v4123_v35  ;;  %v4185_v35 = vld [vmem:[#allocation13 + $0x2f4] ss:$8 sps:$4 sm:$0xff]  }
 0x477   :  { %3367 = vmatprep.subr.bf16.mxu0 %v4128_v36  ;;  %v4183_v36 = vld [vmem:[#allocation13 + $0x2f0] ss:$8 sps:$4 sm:$0xff]  }
 0x47a   :  { %3368 = vmatpush1.bf16.msra.mxu0 %v4126_v38  ;;  %v2510_v38 = vmax.f32 %v3935_v34, 0.0 }
 0x47b   :  { %3369 = vmatprep.subr.bf16.mxu0 %v4131_v39  ;;  %v4188_v39 = vld [vmem:[#allocation13 + $0x304] ss:$8 sps:$4 sm:$0xff]  }
 0x47e   :  { %3370 = vmatpush1.bf16.msra.mxu0 %v4129_v5  ;;  %v4186_v5 = vld [vmem:[#allocation13 + $0x300] ss:$8 sps:$4 sm:$0xff]  }
 0x47f   :  { %3371 = vmatprep.subr.bf16.mxu0 %v4134_v40  ;;  %v2518_v40 = vpack.c.bf16 %v2510_v38, %v2510_v38 }
 0x482   :  { %3372 = vmatpush1.bf16.msra.mxu0 %v4132_v41  ;;  %v4191_v41 = vld [vmem:[#allocation13 + $0x314] ss:$8 sps:$4 sm:$0xff]  }
 0x483   :  { %3373 = vmatprep.subr.bf16.mxu0 %v4137_v12  ;;  %v4189_v12 = vld [vmem:[#allocation13 + $0x310] ss:$8 sps:$4 sm:$0xff]  }
 0x486   :  { %3374 = vmatpush1.bf16.msra.mxu0 %v4135_v42  ;;  %v4194_v42 = vld [vmem:[#allocation13 + $0x324] ss:$8 sps:$4 sm:$0xff]  }
 0x487   :  { %3384 = vmatprep.subr.bf16.mxu0 %v4140_v43  ;;  %v4192_v43 = vld [vmem:[#allocation13 + $0x320] ss:$8 sps:$4 sm:$0xff]  }
 0x4c0   :  { %v2335_v49 = vpop.f32.mrb[12].mxu1 }
 0x4c1   :  { %v3933_v50 = vadd.f32 %v2335_v49, %v869_v46  ;;  %v2337_v51 = vpop.f32.mrb[13].mxu1  ;;  %v4198_v46 = vld [vmem:[#allocation13 + $0x340] ss:$8 sps:$4 sm:$0xff]   ;;  %v4206_v49 = vld [vmem:[#allocation13 + $0x364] ss:$8 sps:$4 sm:$0xff]  }
 0x4c2   :  { %v3934_v52 = vadd.f32 %v2337_v51, %v873_v47  ;;  %v2339_v53 = vpop.f32.mrb[14].mxu1  ;;  %v4203_v47 = vld [vmem:[#allocation13 + $0x354] ss:$8 sps:$4 sm:$0xff]  }
 0x4c3   :  { %v2508_v54 = vmax.f32 %v3933_v50, 0.0  ;;  %v2340_v55 = vpop.f32.mrb[15].mxu1  ;;  %v4204_v50 = vld [vmem:[#allocation13 + $0x360] ss:$8 sps:$4 sm:$0xff]   ;;  %v4209_v51 = vld [vmem:[#allocation13 + $0x374] ss:$8 sps:$4 sm:$0xff]  }
 0x4c4   :  { %v2509_v57 = vmax.f32 %v3934_v52, 0.0  ;;  %v4207_v52 = vld [vmem:[#allocation13 + $0x370] ss:$8 sps:$4 sm:$0xff]   ;;  %v4212_v53 = vld [vmem:[#allocation13 + $0x384] ss:$8 sps:$4 sm:$0xff]  }
 0x4c5   :  { %v2516_v59 = vpack.c.bf16 %v2508_v54, %v2508_v54  ;;  %v4210_v54 = vld [vmem:[#allocation13 + $0x380] ss:$8 sps:$4 sm:$0xff]   ;;  %v4215_v55 = vld [vmem:[#allocation13 + $0x394] ss:$8 sps:$4 sm:$0xff]  }
 0x4c6   :  { %v2517_v29 = vpack.c.bf16 %v2509_v57, %v2509_v57  ;;  %v4218_v57 = vld [vmem:[#allocation13 + $0x3a4] ss:$8 sps:$4 sm:$0xff]  }
 0x4c8   :  { %3375 = vmatprep.mubr.bf16.mxu0 %v2517_v29  ;;  %v4216_v29 = vld [vmem:[#allocation13 + $0x3a0] ss:$8 sps:$4 sm:$0xff]  }
 0x4c9   :  { %3376 = vmatmul.mubr.bf16.vlgmr.msra.gmra.mrb[12].mxu0 %v2516_v59  ;;  %v4219_v59 = vld [vmem:[#allocation13 + $0x3b0] ss:$8 sps:$4 sm:$0xff]  }
 0x4ca   :  { %3385 = vmatpush1.bf16.msra.mxu0 %v4138_v58  ;;  %3416 = vmatprep.mubr.bf16.mxu0 %v2519_v15  ;;  %v4221_v58 = vld [vmem:[#allocation13 + $0x3b4] ss:$8 sps:$4 sm:$0xff]   ;;  %v4222_v15 = vld [vmem:[#allocation13 + $0x3c0] ss:$8 sps:$4 sm:$0xff]  }
 0x4cb   :  { %3386 = vmatprep.subr.bf16.mxu0 %v4143_v60  ;;  %v4224_v60 = vld [vmem:[#allocation13 + $0x3c4] ss:$8 sps:$4 sm:$0xff]  }
 0x4ce   :  { %3387 = vmatpush1.bf16.msra.mxu0 %v4141_v7  ;;  %v4227_v7 = vld [vmem:[#allocation13 + $0x3d4] ss:$8 sps:$4 sm:$0xff]  }
 0x4cf   :  { %3388 = vmatprep.subr.bf16.mxu0 %v4146_v21  ;;  %v884_v21 = vsub.s32 6, %v4608_v3 }
 0x4d2   :  { %3389 = vmatpush1.bf16.msra.mxu0 %v4144_v61  ;;  %v4225_v61 = vld [vmem:[#allocation13 + $0x3d0] ss:$8 sps:$4 sm:$0xff]  }
 0x4d3   :  { %3390 = vmatprep.subr.bf16.mxu0 %v4149_v62  ;;  %v888_v62 = vsub.s32 7, %v4608_v3 }
 0x4d6   :  { %3391 = vmatpush1.bf16.msra.mxu0 %v4147_v63  ;;  %v4230_v63 = vld [vmem:[#allocation13 + $0x3e4] ss:$8 sps:$4 sm:$0xff]  }
 0x4d7   :  { %3392 = vmatprep.subr.bf16.mxu0 %v4152_v30  ;;  %v885_v30 = vrot.slane %v4659_v37, %v884_v21 }
 0x4da   :  { %3393 = vmatpush1.bf16.msra.mxu0 %v4150_v0  ;;  %v889_v0 = vrot.slane %v4659_v37, %v888_v62  ;;  %v2650_v37 = vld [vmem:[%s4707_s10] sm:$0x3] }
 0x4db   :  { %3394 = vmatprep.subr.bf16.mxu0 %v4155_v1  ;;  %v4228_v1 = vld [vmem:[#allocation13 + $0x3e0] ss:$8 sps:$4 sm:$0xff]  }
 0x4de   :  { %3395 = vmatpush1.bf16.msra.mxu0 %v4153_v2  ;;  %v4233_v2 = vld [vmem:[#allocation13 + $0x3f4] ss:$8 sps:$4 sm:$0xff]  }
 0x4df   :  { %3396 = vmatprep.subr.bf16.mxu0 %v4158_v8 }
 0x4e2   :  { %3397 = vmatpush1.bf16.msra.mxu0 %v4156_v9 }
 0x4e3   :  { %3398 = vmatprep.subr.bf16.mxu0 %v4161_v10 }
 0x4e6   :  { %3399 = vmatpush1.bf16.msra.mxu0 %v4159_v11 }
 0x4e7   :  { %3400 = vmatprep.subr.bf16.mxu0 %v4164_v13 }
 0x4ea   :  { %3401 = vmatpush1.bf16.msra.mxu0 %v4162_v14  ;;  %v4231_v14 = vld [vmem:[#allocation13 + $0x3f0] ss:$8 sps:$4 sm:$0xff]  }
 0x4eb   :  { %3402 = vmatprep.subr.bf16.mxu0 %v4167_v17 }
 0x4ee   :  { %3403 = vmatpush1.bf16.msra.mxu0 %v4165_v18 }
 0x4ef   :  { %3404 = vmatprep.subr.bf16.mxu0 %v4170_v19 }
 0x4f2   :  { %3405 = vmatpush1.bf16.msra.mxu0 %v4168_v20 }
 0x4f3   :  { %3406 = vmatprep.subr.bf16.mxu0 %v4173_v22  ;;  %v2655_v22 = vrot.slane %v2650_v37, %v4611_v4 }
 0x4f6   :  { %3407 = vmatpush1.bf16.msra.mxu0 %v4171_v23  ;;  %v2659_v23 = vrot.slane %v2650_v37, %v4619_v6 }
 0x4f7   :  { %3408 = vmatprep.subr.bf16.mxu0 %v4176_v24 }
 0x4fa   :  { %3409 = vmatpush1.bf16.msra.mxu0 %v4174_v25 }
 0x4fb   :  { %3410 = vmatprep.subr.bf16.mxu0 %v4179_v27 }
 0x4fe   :  { %3411 = vmatpush1.bf16.msra.mxu0 %v4177_v28 }
 0x4ff   :  { %3412 = vmatprep.subr.bf16.mxu0 %v4182_v32 }
 0x502   :  { %3413 = vmatpush1.bf16.msra.mxu0 %v4180_v33 }
 0x503   :  { %3414 = vmatprep.subr.bf16.mxu0 %v4185_v35 }
 0x506   :  { %3415 = vmatpush1.bf16.msra.mxu0 %v4183_v36 }
 0x507   :  { %3425 = vmatprep.subr.bf16.mxu0 %v4188_v39 }
 0x509   :  { %3417 = vmatmul.mubr.bf16.vlgmr.msra.gmra.mrb[12].mxu0 %v2518_v40 }
 0x50a   :  { %3426 = vmatpush1.bf16.msra.mxu0 %v4186_v5 }
 0x50b   :  { %3427 = vmatprep.subr.bf16.mxu0 %v4191_v41 }
 0x50e   :  { %3428 = vmatpush1.bf16.msra.mxu0 %v4189_v12 }
 0x50f   :  { %3429 = vmatprep.subr.bf16.mxu0 %v4194_v42 }
 0x512   :  { %3430 = vmatpush1.bf16.msra.mxu0 %v4192_v43 }
 0x513   :  { %3431 = vmatprep.subr.bf16.mxu0 %v4197_v16 }
 0x516   :  { %3432 = vmatpush1.bf16.msra.mxu0 %v4195_v44 }
 0x517   :  { %3433 = vmatprep.subr.bf16.mxu0 %v4200_v45 }
 0x51a   :  { %3434 = vmatpush1.bf16.msra.mxu0 %v4198_v46 }
 0x51b   :  { %3435 = vmatprep.subr.bf16.mxu0 %v4203_v47 }
 0x51e   :  { %3436 = vmatpush1.bf16.msra.mxu0 %v4201_v48 }
 0x51f   :  { %3437 = vmatprep.subr.bf16.mxu0 %v4206_v49 }
 0x522   :  { %3438 = vmatpush1.bf16.msra.mxu0 %v4204_v50 }
 0x523   :  { %3439 = vmatprep.subr.bf16.mxu0 %v4209_v51 }
 0x526   :  { %3440 = vmatpush1.bf16.msra.mxu0 %v4207_v52 }
 0x527   :  { %3441 = vmatprep.subr.bf16.mxu0 %v4212_v53 }
 0x52a   :  { %3442 = vmatpush1.bf16.msra.mxu0 %v4210_v54 }
 0x52b   :  { %3443 = vmatprep.subr.bf16.mxu0 %v4215_v55 }
 0x52e   :  { %3444 = vmatpush1.bf16.msra.mxu0 %v4213_v56 }
 0x52f   :  { %3445 = vmatprep.subr.bf16.mxu0 %v4218_v57 }
 0x532   :  { %3446 = vmatpush1.bf16.msra.mxu0 %v4216_v29 }
 0x533   :  { %3447 = vmatprep.subr.bf16.mxu0 %v4221_v58 }
 0x536   :  { %3448 = vmatpush1.bf16.msra.mxu0 %v4219_v59 }
 0x537   :  { %3449 = vmatprep.subr.bf16.mxu0 %v4224_v60 }
 0x53a   :  { %3450 = vmatpush1.bf16.msra.mxu0 %v4222_v15 }
 0x53b   :  { %3451 = vmatprep.subr.bf16.mxu0 %v4227_v7 }
 0x53e   :  { %3452 = vmatpush1.bf16.msra.mxu0 %v4225_v61 }
 0x53f   :  { %3453 = vmatprep.subr.bf16.mxu0 %v4230_v63 }
 0x540   :  { %v2499_v8 = vpop.f32.mrb[16].mxu1 }
 0x541   :  { %v3937_v9 = vadd.f32 %v2499_v8, %v885_v30  ;;  %v2501_v10 = vpop.f32.mrb[17].mxu1 }
 0x542   :  { %v3938_v11 = vadd.f32 %v2501_v10, %v889_v0  ;;  %v2503_v13 = vpop.f32.mrb[18].mxu1  ;;  %3454 = vmatpush1.bf16.msra.mxu0 %v4228_v1 }
 0x543   :  { %v2512_v17 = vmax.f32 %v3937_v9, 0.0  ;;  %v2504_v18 = vpop.f32.mrb[19].mxu1  ;;  %3455 = vmatprep.subr.bf16.mxu0 %v4233_v2 }
 0x544   :  { %v2513_v3 = vmax.f32 %v3938_v11, 0.0 }
 0x545   :  { %v2520_v20 = vpack.c.bf16 %v2512_v17, %v2512_v17 }
 0x546   :  { %v2521_v19 = vpack.c.bf16 %v2513_v3, %v2513_v3  ;;  %3456 = vmatpush1.bf16.msra.mxu0 %v4231_v14 }
 0x548   :  { %3457 = vmatprep.mubr.bf16.mxu0 %v2521_v19 }
 0x549   :  { %3458 = vmatmul.mubr.bf16.vlgmr.msra.gmra.mrb[12].mxu0 %v2520_v20 }
 0x61c   :  { %v3459_v24 = vpop.f32.mrb[12].mxu0 }
 0x61d   :  { %v3939_v25 = vadd.f32 %v3459_v24, %v2655_v22  ;;  %v3461_v26 = vpop.f32.mrb[13].mxu0 }
 0x61e   :  { %v3940_v27 = vadd.f32 %v3461_v26, %v2659_v23  ;;  %v3463_v28 = vpop.f32.mrb[14].mxu0 }
 0x61f   :  { %3466 = vst [vmem:[%s4708_s11] sm:$0xff] %v3939_v25  ;;  %v3464_v31 = vpop.f32.mrb[15].mxu0 }
 0x620   :  { %3467 = vst [vmem:[%s4708_s11 + $0x8] sm:$0xff] %v3940_v27 }
 0x621   :  { %3472 = vsyncpa [#allocation3], 1 }
 0x622   :  { %3473 = vsyncpa [#allocation5], 1 }
 0x623   :  { %3474 = vsyncpa [#allocation8], 1 }
 0x624   :  { %3475 = vsyncpa [#allocation11], 1 }
 0x625   :  { %3476 = vsyncpa [#allocation14], 1 }

</bundles_post_ra>
